<compile_context>
chip_gen: v7x
topology: tpu7x:2x2x1
jax: 0.10.0
libtpu: 0.0.40
codegen_flags: <defaults>
</compile_context>

<pallas_src>
import functools

import jax
import jax.numpy as jnp
from jax.experimental import pallas as pl
from jax.experimental.pallas import tpu as pltpu

_OUT_PAD = 128   # lane-dense minor dim for folded weight / output
_SUBLANE = 8


def _round_up(x, m):
    return (x + m - 1) // m * m


def _vmem_budget_bytes():
    """Generation-aware VMEM working-set budget (bytes)."""
    try:
        physical = int(pltpu.get_tpu_info().vmem_capacity_bytes)
    except Exception:
        physical = 64 * 1024 * 1024   # conservative fallback (v7x per-TC VMEM)
    # Leave headroom for Mosaic internal scratch; cap at 75% of physical.
    return max(32 * 1024 * 1024,
               min(physical - 16 * 1024 * 1024, (physical * 3) // 4))


def fold_fc_params(weight, bias, hw, *, compute_dtype=jnp.bfloat16):
    """Build (ONCE per weight value) the pooling-folded FC weight & padded bias.

    weight: (OUT, C)  -- torch nn.Linear layout;  bias: (OUT,)
    Returns:
      w_big: (C*hw, 128) compute_dtype  -- pure repeat of W^T, zero-padded lanes
      b_pad: (1, 128)    float32
    The 1/hw average is NOT folded here; it is applied to the f32 accumulator
    in the kernel epilogue.
    """
    out_dim, _ = weight.shape
    w_big = jnp.repeat(weight.T.astype(jnp.float32), hw, axis=0)          # (C*hw, OUT)
    w_big = jnp.pad(w_big, ((0, 0), (0, _OUT_PAD - out_dim))).astype(compute_dtype)
    b_pad = jnp.pad(bias.astype(jnp.float32),
                    (0, _OUT_PAD - out_dim)).reshape(1, _OUT_PAD)
    return w_big, b_pad


def _pooled_fc_kernel(x_ref, w_ref, b_ref, o_ref, *, inv_hw):
    # x_ref: (TN, K)        input dtype (f32 or bf16) -- cast on the VPU here
    # w_ref: (K, OUT_PAD)   bf16  -- VMEM-resident, single-buffered
    # b_ref: (1, OUT_PAD)   f32   -- VMEM-resident, single-buffered
    # o_ref: (TN, OUT_PAD)  f32
    x = x_ref[...].astype(jnp.bfloat16)
    acc = jnp.dot(x, w_ref[...], preferred_element_type=jnp.float32)
    o_ref[...] = acc * inv_hw + b_ref[...]


def resnet_part2_forward(x_nchw, w_big, b_pad, out_dim):
    """x_nchw: (N, C, H, W); w_big/b_pad from fold_fc_params. Returns (N, out_dim) f32."""
    n, c, h, w = x_nchw.shape
    hw = h * w
    k = c * hw
    assert w_big.shape == (k, _OUT_PAD), (w_big.shape, (k, _OUT_PAD))
    assert b_pad.shape == (1, _OUT_PAD)

    # Lane-dense activation view; NO dtype copy in the wrapper (cast is in-kernel).
    x_flat = x_nchw.reshape(n, k)
    x_itemsize = jnp.dtype(x_flat.dtype).itemsize

    # ---- VMEM sizing (generation-aware) --------------------------------------
    budget = _vmem_budget_bytes()
    w_bytes = w_big.size * jnp.dtype(w_big.dtype).itemsize      # single-buffered
    b_bytes = b_pad.size * 4                                     # single-buffered
    per_row = 2 * k * x_itemsize + 2 * _OUT_PAD * 4              # dbl-buffered x + out
    avail = budget - w_bytes - b_bytes
    if avail < _SUBLANE * per_row:
        raise ValueError(
            f"VMEM budget {budget} B cannot hold the resident weight ({w_bytes} B) "
            f"plus a minimum {_SUBLANE}-row tile ({_SUBLANE * per_row} B); K={k} too large.")
    tn_cap = (avail // per_row) // _SUBLANE * _SUBLANE
    tn = int(min(256, tn_cap, _round_up(n, _SUBLANE)))

    # v7x megacore: guarantee >=2 grid steps when the batch allows it so the
    # "parallel" N axis actually shards across both TensorCores.
    if n > _SUBLANE and -(-n // tn) == 1:
        tn = max(_SUBLANE, _round_up(-(-n // 2), _SUBLANE))

    n_pad = _round_up(n, tn)
    if n_pad != n:
        x_flat = jnp.pad(x_flat, ((0, n_pad - n), (0, 0)))
    grid = (n_pad // tn,)

    bytes_accessed = (x_flat.size * x_itemsize + w_bytes + b_bytes
                      + n_pad * _OUT_PAD * 4)
    cost = pl.CostEstimate(flops=2 * n_pad * k * _OUT_PAD,
                           transcendentals=0,
                           bytes_accessed=bytes_accessed)

    kernel = functools.partial(_pooled_fc_kernel, inv_hw=1.0 / float(hw))

    out = pl.pallas_call(
        kernel,
        out_shape=jax.ShapeDtypeStruct((n_pad, _OUT_PAD), jnp.float32),
        grid=grid,
        in_specs=[
            # activations: tiled over N, double-buffered by default
            pl.BlockSpec((tn, k), lambda i: (i, 0)),
            # folded weight: grid-invariant -> single-buffered, VMEM-resident
            pl.BlockSpec((k, _OUT_PAD), lambda i: (0, 0),
                         pipeline_mode=pl.Buffered(1)),
            # bias: grid-invariant -> single-buffered
            pl.BlockSpec((1, _OUT_PAD), lambda i: (0, 0),
                         pipeline_mode=pl.Buffered(1)),
        ],
        out_specs=pl.BlockSpec((tn, _OUT_PAD), lambda i: (i, 0)),
        compiler_params=pltpu.CompilerParams(
            dimension_semantics=("parallel",),      # shard N-tiles across TCs on v7x
            vmem_limit_bytes=int(budget),           # lift v5e's 16 MiB default scoped limit
        ),
        cost_estimate=cost,
    )(x_flat, w_big, b_pad)

    return out[:n, :out_dim]


def _reference(x_nchw, weight, bias):
    pooled = jnp.mean(x_nchw.astype(jnp.float32), axis=(2, 3))   # (N, C)
    return pooled @ weight.T.astype(jnp.float32) + bias.astype(jnp.float32)


if __name__ == "__main__":
    key = jax.random.PRNGKey(0)
    kx, kw, kb = jax.random.split(key, 3)

    # Small but semantically consistent shapes: fc expects 512 input channels.
    N, C, H, W = 2, 512, 4, 4
    OUT = 9

    x = jax.random.normal(kx, (N, C, H, W), dtype=jnp.float32)
    bound = 1.0 / jnp.sqrt(jnp.float32(C))
    weight = jax.random.uniform(kw, (OUT, C), minval=-bound, maxval=bound,
                                dtype=jnp.float32)
    bias = jax.random.uniform(kb, (OUT,), minval=-bound, maxval=bound,
                              dtype=jnp.float32)

    # Fold / pad the FC params ONCE (model-init-time cost, reused every forward).
    w_big, b_pad = fold_fc_params(weight, bias, H * W)
    w_big, b_pad = jax.block_until_ready((w_big, b_pad))

    out = resnet_part2_forward(x, w_big, b_pad, OUT)
    out = jax.block_until_ready(out)

    ref = _reference(x, weight, bias)
    assert out.shape == (N, OUT)
    # bf16 matmul inputs / f32 accumulation -> relaxed (but tight for bf16) tolerance.
    assert jnp.allclose(out, ref, atol=1e-2, rtol=1e-2), "mismatch vs reference"

    print("KERNEL_OK")
</pallas_src>

<mosaic_0001>
module attributes {stable_mosaic.version = 11 : i64} {
  func.func @_pooled_fc_kernel(%arg0: i32, %arg1: memref<8x8192xf32, #tpu.memory_space<vmem>>, %arg2: memref<8192x128xbf16, #tpu.memory_space<vmem>>, %arg3: memref<1x128xf32, #tpu.memory_space<vmem>>, %arg4: memref<8x128xf32, #tpu.memory_space<vmem>>) attributes {dimension_semantics = [#tpu.dimension_semantics<parallel>], iteration_bounds = array<i64: 1>, scalar_prefetch = 0 : i64, scratch_operands = 0 : i64, tpu.core_type = #tpu.core_type<tc>, window_params = [{transform_indices = @transform_0, window_bounds = array<i64: 8, 8192>}, {pipeline_mode = #tpu.pipeline_mode<synchronous>, transform_indices = @transform_1, window_bounds = array<i64: 8192, 128>}, {pipeline_mode = #tpu.pipeline_mode<synchronous>, transform_indices = @transform_2, window_bounds = array<i64: 1, 128>}, {transform_indices = @transform_3, window_bounds = array<i64: 8, 128>}]} {
    %c0 = arith.constant 0 : index
    %c0_0 = arith.constant 0 : index
    %0 = vector.load %arg1[%c0, %c0_0] : memref<8x8192xf32, #tpu.memory_space<vmem>>, vector<8x8192xf32>
    %1 = arith.truncf %0 : vector<8x8192xf32> to vector<8x8192xbf16>
    %c0_1 = arith.constant 0 : index
    %c0_2 = arith.constant 0 : index
    %2 = vector.load %arg2[%c0_1, %c0_2] : memref<8192x128xbf16, #tpu.memory_space<vmem>>, vector<8192x128xbf16>
    %cst = arith.constant dense<0.000000e+00> : vector<8x128xf32>
    %3 = tpu.matmul %1, %2, %cst {dimension_numbers = #tpu.dot_dimension_numbers<[1], [0], [0], [1], [0, 0, 1, 1], [], []>} : vector<8x8192xbf16>, vector<8192x128xbf16>, vector<8x128xf32> -> vector<8x128xf32>
    %cst_3 = arith.constant 6.250000e-02 : f32
    %4 = vector.broadcast %cst_3 : f32 to vector<8x128xf32>
    %5 = arith.mulf %3, %4 : vector<8x128xf32>
    %c0_4 = arith.constant 0 : index
    %c0_5 = arith.constant 0 : index
    %6 = vector.load %arg3[%c0_4, %c0_5] : memref<1x128xf32, #tpu.memory_space<vmem>>, vector<1x128xf32>
    %7 = vector.broadcast %6 : vector<1x128xf32> to vector<8x128xf32>
    %8 = arith.addf %5, %7 : vector<8x128xf32>
    %c0_6 = arith.constant 0 : index
    %c0_7 = arith.constant 0 : index
    %9 = vector.load %arg4[%c0_6, %c0_7] : memref<8x128xf32, #tpu.memory_space<vmem>>, vector<8x128xf32>
    tpu.vector_store %arg4[%c0_6, %c0_7], %8 {strides = array<i32>} : memref<8x128xf32, #tpu.memory_space<vmem>>, vector<8x128xf32>,
    return
  }
  func.func @transform_0(%arg0: i32) -> (i32, i32) {
    %c0_i32 = arith.constant 0 : i32
    %c0_i32_0 = arith.constant 0 : i32
    return %arg0, %c0_i32 : i32, i32
  }
  func.func @transform_1(%arg0: i32) -> (i32, i32) {
    %c0_i32 = arith.constant 0 : i32
    %c0_i32_0 = arith.constant 0 : i32
    %c0_i32_1 = arith.constant 0 : i32
    return %c0_i32, %c0_i32_0 : i32, i32
  }
  func.func @transform_2(%arg0: i32) -> (i32, i32) {
    %c0_i32 = arith.constant 0 : i32
    %c0_i32_0 = arith.constant 0 : i32
    %c0_i32_1 = arith.constant 0 : i32
    return %c0_i32, %c0_i32_0 : i32, i32
  }
  func.func @transform_3(%arg0: i32) -> (i32, i32) {
    %c0_i32 = arith.constant 0 : i32
    %c0_i32_0 = arith.constant 0 : i32
    return %arg0, %c0_i32 : i32, i32
  }
}

</mosaic_0001>

<bundles_post_ra>
// kernel: tpu_custom_call.1
= control target key start
LH: loop header
LB: loop body
LE: loop exit
PB: predicated region body
PF: predicated region fallthrough
CT: control target
= control target key end

     0   :  { %8 = vsyncpa [#allocation3], 0  ;;  %s7510_s0 = inlined_call_operand.hbm [shape: f32[8,8192], index: 0, kind: input, shape index: {}]   ;;  %s7511_s1 = inlined_call_operand.hbm [shape: bf16[8192,128], index: 1, kind: input, shape index: {}]   ;;  %s7512_s2 = inlined_call_operand.hbm [shape: f32[1,128], index: 2, kind: input, shape index: {}]   ;;  %s7513_s3 = inlined_call_operand.hbm [shape: f32[8,128], index: 3, kind: output, shape index: {}]  }
   0x1   :  { %9 = vsyncpa [#allocation6], 0 }
   0x2   :  { %10 = vsyncpa [#allocation4], 0  ;;  %s7412_s12 = smov [#allocation5]   ;;  %s7318_s16 = scalar_lea.hbm %s7511_s1, 65536 }
   0x3   :  { %s26_s13 = sshll.u32 %s7412_s12, 4  ;;  %p7319_p0 = scmp.ne.s32.totalorder %s7511_s1, %s7318_s16  ;;  %s27_s13 = int_to_ptr.vmem [resolvable:$true] %s26_s13 }
   0x4   :  { %p7322_p1 = scmp.lt.u32.totalorder %s7318_s16, %s7511_s1 }
   0x6   :  { %p7324_p2 = pnand %p7322_p1, %p7319_p0 }
   0x8   :  { %7327 = shalt.err (!%p7324_p2)
}
   0x9   :  { %s7328_s21 = scalar_lea.vmem %s27_s13, 65536  ;;  %p7333_p4 = scmp.lt.s32.totalorder %s27_s13, %s27_s13 }
   0xa   :  { %p7329_p3 = scmp.ne.s32.totalorder %s27_s13, %s7328_s21  ;;  %p7334_p5 = scmp.lt.s32.totalorder %s7328_s21, %s7328_s21 }
   0xc   :  { %p7335_p6 = por %p7334_p5, %p7333_p4 }
   0xe   :  { %p7336_p7 = pnand %p7335_p6, %p7329_p3 }
  0x10   :  { %7339 = shalt.err (!%p7336_p7)
}
  0x11   :  { %s7413_s22 = smov 64   ;;  %s7414_s23 = smov 4  }
  0x12   :  { %32 = dma.hbm_to_vmem [thread:$0]  %s7511_s1, 65536, %s27_s13, [#allocation6], %s7413_s22, %s7413_s22, %s7414_s23  }
  0x13   :  { %s7415_s26 = smov [#allocation2]   ;;  %s7416_s28 = smov [#allocation7]  }
  0x14   :  { %s17_s27 = sshll.u32 %s7415_s26, 4  ;;  %s39_s29 = sshll.u32 %s7416_s28, 4  ;;  %s18_s27 = int_to_ptr.vmem [resolvable:$true] %s17_s27  ;;  %s40_s29 = int_to_ptr.vmem [resolvable:$true] %s39_s29 }
  0x15   :  { %s7340_s5 = scalar_lea.hbm %s7510_s0, 8192 }
  0x16   :  { %p7341_p8 = scmp.ne.s32.totalorder %s7510_s0, %s7340_s5  ;;  %p7344_p9 = scmp.lt.u32.totalorder %s7340_s5, %s7510_s0 }
  0x18   :  { %p7346_p10 = pnand %p7344_p9, %p7341_p8 }
  0x1a   :  { %7349 = shalt.err (!%p7346_p10)
}
  0x1b   :  { %s7350_s1 = scalar_lea.vmem %s18_s27, 8192  ;;  %p7355_p12 = scmp.lt.s32.totalorder %s18_s27, %s18_s27 }
  0x1c   :  { %p7351_p11 = scmp.ne.s32.totalorder %s18_s27, %s7350_s1  ;;  %p7356_p13 = scmp.lt.s32.totalorder %s7350_s1, %s7350_s1 }
  0x1e   :  { %p7357_p0 = por %p7356_p13, %p7355_p12 }
  0x20   :  { %p7358_p1 = pnand %p7357_p0, %p7351_p11 }
  0x22   :  { %7361 = shalt.err (!%p7358_p1)
}
  0x23   :  { %20 = dma.hbm_to_vmem [thread:$0]  %s7510_s0, 8192, %s18_s27, [#allocation3]  }
  0x24   :  { %s7362_s14 = scalar_lea.hbm %s7512_s2, 16 }
  0x25   :  { %p7363_p2 = scmp.ne.s32.totalorder %s7512_s2, %s7362_s14  ;;  %p7366_p3 = scmp.lt.u32.totalorder %s7362_s14, %s7512_s2 }
  0x27   :  { %p7368_p4 = pnand %p7366_p3, %p7363_p2 }
  0x29   :  { %7371 = shalt.err (!%p7368_p4)
}
  0x2a   :  { %s7372_s19 = scalar_lea.vmem %s40_s29, 16  ;;  %s7376_s20 = scalar_lea.vmem %s40_s29, 32 }
  0x2b   :  { %p7373_p5 = scmp.ne.s32.totalorder %s40_s29, %s7372_s19  ;;  %p7377_p6 = scmp.lt.s32.totalorder %s40_s29, %s40_s29 }
  0x2c   :  { %p7378_p7 = scmp.lt.s32.totalorder %s7376_s20, %s7372_s19 }
  0x2e   :  { %p7379_p8 = por %p7378_p7, %p7377_p6 }
  0x30   :  { %p7380_p9 = pnand %p7379_p8, %p7373_p5 }
  0x32   :  { %7383 = shalt.err (!%p7380_p9)
}
  0x33   :  { %42 = dma.hbm_to_vmem [thread:$0]  %s7512_s2, 16, %s40_s29, [#allocation6]  }
  0x34   :  { %7406 = dma.done.wait [#allocation3], 8192  }
  0x35   :  { %7407 = vsyncadd [#allocation3], 4294959104 }
  0x36   :  { %7408 = dma.done.wait [#allocation6], 65552  }
  0x37   :  { %7409 = vsyncadd [#allocation6], 4294901744  ;;  %v6806_v0 = vld [vmem:[#allocation5 + $0x40] sm:$0xff]   ;;  %v6810_v4 = vld [vmem:[#allocation5 + $0x48] sm:$0xff]   ;;  %s7417_s2 = smov [#allocation8]  }
  0x38   :  { %v6807_v1 = vld [vmem:[#allocation5 + $0xc0] sm:$0xff]   ;;  %6096 = vmatprep.subr.bf16.mxu0 %v6806_v0  ;;  %v6811_v5 = vld [vmem:[#allocation5 + $0xc8] sm:$0xff]   ;;  %v6814_v8 = vld [vmem:[#allocation5 + $0x50] sm:$0xff]   ;;  %s5573_s22 = sshll.u32 %s7417_s2, 4  ;;  %s5574_s22 = int_to_ptr.vmem [resolvable:$true] %s5573_s22 }
  0x39   :  { %v6808_v2 = vld [vmem:[#allocation5] sm:$0xff]   ;;  %6118 = vmatprep.subr.bf16.mxu1 %v6807_v1  ;;  %v6812_v6 = vld [vmem:[#allocation5 + $0x8] sm:$0xff]   ;;  %v6815_v9 = vld [vmem:[#allocation5 + $0xd0] sm:$0xff]   ;;  %s7384_s23 = scalar_lea.vmem %s5574_s22, 128  ;;  %p7389_p11 = scmp.lt.s32.totalorder %s5574_s22, %s5574_s22 }
  0x3a   :  { %v6809_v3 = vld [vmem:[#allocation5 + $0x80] sm:$0xff]   ;;  %6097 = vmatpush3.bf16.msra.mxu0 %v6808_v2  ;;  %v6813_v7 = vld [vmem:[#allocation5 + $0x88] sm:$0xff]   ;;  %v6816_v10 = vld [vmem:[#allocation5 + $0x10] sm:$0xff]   ;;  %p7385_p10 = scmp.ne.s32.totalorder %s5574_s22, %s7384_s23  ;;  %p7390_p12 = scmp.lt.s32.totalorder %s7384_s23, %s7384_s23 }
  0x3b   :  { %6119 = vmatpush3.bf16.msra.mxu1 %v6809_v3  ;;  %6098 = vmatprep.subr.bf16.mxu0 %v6810_v4  ;;  %v6817_v11 = vld [vmem:[#allocation5 + $0x90] sm:$0xff]   ;;  %v6818_v12 = vld [vmem:[#allocation5 + $0x58] sm:$0xff]   ;;  %v6822_v16 = vld [vmem:[#allocation5 + $0x60] sm:$0xff]  }
  0x3c   :  { %6120 = vmatprep.subr.bf16.mxu1 %v6811_v5  ;;  %v6819_v13 = vld [vmem:[#allocation5 + $0xd8] sm:$0xff]   ;;  %v6823_v17 = vld [vmem:[#allocation5 + $0xe0] sm:$0xff]   ;;  %v6826_v20 = vld [vmem:[#allocation5 + $0x68] sm:$0xff]   ;;  %p7391_p13 = por %p7390_p12, %p7389_p11 }
  0x3d   :  { %v6820_v14 = vld [vmem:[#allocation5 + $0x18] sm:$0xff]   ;;  %v6824_v18 = vld [vmem:[#allocation5 + $0x20] sm:$0xff]   ;;  %v6827_v21 = vld [vmem:[#allocation5 + $0xe8] sm:$0xff]  }
  0x3e   :  { %6099 = vmatpush3.bf16.msra.mxu0 %v6812_v6  ;;  %v6821_v15 = vld [vmem:[#allocation5 + $0x98] sm:$0xff]   ;;  %v6825_v19 = vld [vmem:[#allocation5 + $0xa0] sm:$0xff]   ;;  %v6828_v22 = vld [vmem:[#allocation5 + $0x28] sm:$0xff]   ;;  %p7392_p0 = pnand %p7391_p13, %p7385_p10 }
  0x3f   :  { %6121 = vmatpush3.bf16.msra.mxu1 %v6813_v7  ;;  %6100 = vmatprep.subr.bf16.mxu0 %v6814_v8  ;;  %v6829_v23 = vld [vmem:[#allocation5 + $0xa8] sm:$0xff]   ;;  %v6830_v24 = vld [vmem:[#allocation5 + $0x70] sm:$0xff]   ;;  %v6834_v28 = vld [vmem:[#allocation5 + $0x78] sm:$0xff]  }
  0x40   :  { %6122 = vmatprep.subr.bf16.mxu1 %v6815_v9  ;;  %v6831_v25 = vld [vmem:[#allocation5 + $0xf0] sm:$0xff]   ;;  %v6835_v29 = vld [vmem:[#allocation5 + $0xf8] sm:$0xff]   ;;  %v54_v32 = vld [vmem:[#allocation2 + $0x8] sm:$0xff] }
  0x41   :  { %v6832_v26 = vld [vmem:[#allocation5 + $0x30] sm:$0xff]   ;;  %v6836_v30 = vld [vmem:[#allocation5 + $0x38] sm:$0xff]   ;;  %v53_v34 = vld [vmem:[#allocation2] sm:$0xff]  ;;  %v118_v35 = vpack.c.bf16 %v54_v32, %v54_v32 }
  0x42   :  { %6101 = vmatpush3.bf16.msra.mxu0 %v6816_v10  ;;  %v6833_v27 = vld [vmem:[#allocation5 + $0xb0] sm:$0xff]   ;;  %v6837_v31 = vld [vmem:[#allocation5 + $0xb8] sm:$0xff]   ;;  %v117_v37 = vpack.c.bf16 %v53_v34, %v53_v34  ;;  %v6838_v40 = vld [vmem:[#allocation5 + $0x140] sm:$0xff]  }
  0x43   :  { %6123 = vmatpush3.bf16.msra.mxu1 %v6817_v11  ;;  %6102 = vmatprep.subr.bf16.mxu0 %v6818_v12  ;;  %v56_v33 = vld [vmem:[#allocation2 + $0x18] sm:$0xff]  ;;  %v55_v38 = vld [vmem:[#allocation2 + $0x10] sm:$0xff]  ;;  %v6839_v41 = vld [vmem:[#allocation5 + $0x1c0] sm:$0xff]  }
  0x44   :  { %6124 = vmatprep.subr.bf16.mxu1 %v6819_v13  ;;  %v120_v36 = vpack.c.bf16 %v56_v33, %v56_v33  ;;  %v119_v39 = vpack.c.bf16 %v55_v38, %v55_v38  ;;  %4309 = vmatprep.mubr.bf16.mxu0 %v118_v35  ;;  %v6840_v42 = vld [vmem:[#allocation5 + $0x100] sm:$0xff]   ;;  %v6842_v44 = vld [vmem:[#allocation5 + $0x148] sm:$0xff]   ;;  %v6846_v48 = vld [vmem:[#allocation5 + $0x150] sm:$0xff]  }
  0x45   :  { %v6841_v43 = vld [vmem:[#allocation5 + $0x180] sm:$0xff]   ;;  %v6843_v45 = vld [vmem:[#allocation5 + $0x1c8] sm:$0xff]   ;;  %v6847_v49 = vld [vmem:[#allocation5 + $0x1d0] sm:$0xff]  }
  0x46   :  { %6103 = vmatpush3.bf16.msra.mxu0 %v6820_v14  ;;  %4349 = vmatprep.mubr.bf16.mxu1 %v120_v36  ;;  %v6844_v46 = vld [vmem:[#allocation5 + $0x108] sm:$0xff]   ;;  %v6848_v50 = vld [vmem:[#allocation5 + $0x110] sm:$0xff]   ;;  %v6850_v52 = vld [vmem:[#allocation5 + $0x158] sm:$0xff]  }
  0x47   :  { %6125 = vmatpush3.bf16.msra.mxu1 %v6821_v15  ;;  %6104 = vmatprep.subr.bf16.mxu0 %v6822_v16  ;;  %v6845_v47 = vld [vmem:[#allocation5 + $0x188] sm:$0xff]   ;;  %v6849_v51 = vld [vmem:[#allocation5 + $0x190] sm:$0xff]   ;;  %v6851_v53 = vld [vmem:[#allocation5 + $0x1d8] sm:$0xff]  }
  0x48   :  { %6126 = vmatprep.subr.bf16.mxu1 %v6823_v17  ;;  %v6852_v54 = vld [vmem:[#allocation5 + $0x118] sm:$0xff]   ;;  %v6854_v56 = vld [vmem:[#allocation5 + $0x160] sm:$0xff]   ;;  %v6858_v60 = vld [vmem:[#allocation5 + $0x168] sm:$0xff]  }
  0x49   :  { %v6853_v55 = vld [vmem:[#allocation5 + $0x198] sm:$0xff]   ;;  %v6855_v57 = vld [vmem:[#allocation5 + $0x1e0] sm:$0xff]   ;;  %v6859_v61 = vld [vmem:[#allocation5 + $0x1e8] sm:$0xff]  }
  0x4a   :  { %6105 = vmatpush3.bf16.msra.mxu0 %v6824_v18  ;;  %v6856_v58 = vld [vmem:[#allocation5 + $0x120] sm:$0xff]   ;;  %v6860_v62 = vld [vmem:[#allocation5 + $0x128] sm:$0xff]   ;;  %v6862_v0 = vld [vmem:[#allocation5 + $0x170] sm:$0xff]  }
  0x4b   :  { %6127 = vmatpush3.bf16.msra.mxu1 %v6825_v19  ;;  %6106 = vmatprep.subr.bf16.mxu0 %v6826_v20  ;;  %v6857_v59 = vld [vmem:[#allocation5 + $0x1a0] sm:$0xff]   ;;  %v6861_v63 = vld [vmem:[#allocation5 + $0x1a8] sm:$0xff]   ;;  %v6863_v1 = vld [vmem:[#allocation5 + $0x1f0] sm:$0xff]  }
  0x4c   :  { %6128 = vmatprep.subr.bf16.mxu1 %v6827_v21  ;;  %v6864_v2 = vld [vmem:[#allocation5 + $0x130] sm:$0xff]   ;;  %v6866_v4 = vld [vmem:[#allocation5 + $0x178] sm:$0xff]   ;;  %v58_v8 = vld [vmem:[#allocation2 + $0x28] sm:$0xff] }
  0x4d   :  { %v6865_v3 = vld [vmem:[#allocation5 + $0x1b0] sm:$0xff]   ;;  %v6867_v5 = vld [vmem:[#allocation5 + $0x1f8] sm:$0xff]   ;;  %v122_v10 = vpack.c.bf16 %v58_v8, %v58_v8  ;;  %v57_v12 = vld [vmem:[#allocation2 + $0x20] sm:$0xff] }
  0x4e   :  { %6107 = vmatpush3.bf16.msra.mxu0 %v6828_v22  ;;  %v6868_v6 = vld [vmem:[#allocation5 + $0x138] sm:$0xff]   ;;  %v59_v13 = vld [vmem:[#allocation2 + $0x30] sm:$0xff]  ;;  %v121_v14 = vpack.c.bf16 %v57_v12, %v57_v12  ;;  %v6870_v16 = vld [vmem:[#allocation5 + $0x240] sm:$0xff]  }
  0x4f   :  { %6129 = vmatpush3.bf16.msra.mxu1 %v6829_v23  ;;  %6108 = vmatprep.subr.bf16.mxu0 %v6830_v24  ;;  %v6869_v7 = vld [vmem:[#allocation5 + $0x1b8] sm:$0xff]   ;;  %v123_v15 = vpack.c.bf16 %v59_v13, %v59_v13  ;;  %v6871_v17 = vld [vmem:[#allocation5 + $0x2c0] sm:$0xff]   ;;  %v6874_v20 = vld [vmem:[#allocation5 + $0x248] sm:$0xff]  }
  0x50   :  { %6130 = vmatprep.subr.bf16.mxu1 %v6831_v25  ;;  %v60_v9 = vld [vmem:[#allocation2 + $0x38] sm:$0xff]  ;;  %v6872_v18 = vld [vmem:[#allocation5 + $0x200] sm:$0xff]   ;;  %v6875_v21 = vld [vmem:[#allocation5 + $0x2c8] sm:$0xff]  }
  0x51   :  { %v124_v11 = vpack.c.bf16 %v60_v9, %v60_v9  ;;  %v6873_v19 = vld [vmem:[#allocation5 + $0x280] sm:$0xff]   ;;  %v6876_v22 = vld [vmem:[#allocation5 + $0x208] sm:$0xff]   ;;  %v6878_v24 = vld [vmem:[#allocation5 + $0x250] sm:$0xff]  }
  0x52   :  { %6109 = vmatpush3.bf16.msra.mxu0 %v6832_v26  ;;  %v6877_v23 = vld [vmem:[#allocation5 + $0x288] sm:$0xff]   ;;  %v6879_v25 = vld [vmem:[#allocation5 + $0x2d0] sm:$0xff]   ;;  %v6886_v32 = vld [vmem:[#allocation5 + $0x260] sm:$0xff]  }
  0x53   :  { %6131 = vmatpush3.bf16.msra.mxu1 %v6833_v27  ;;  %6110 = vmatprep.subr.bf16.mxu0 %v6834_v28  ;;  %v6880_v26 = vld [vmem:[#allocation5 + $0x210] sm:$0xff]   ;;  %v6882_v28 = vld [vmem:[#allocation5 + $0x258] sm:$0xff]   ;;  %v6887_v33 = vld [vmem:[#allocation5 + $0x2e0] sm:$0xff]  }
  0x54   :  { %6132 = vmatprep.subr.bf16.mxu1 %v6835_v29  ;;  %v6881_v27 = vld [vmem:[#allocation5 + $0x290] sm:$0xff]   ;;  %v6883_v29 = vld [vmem:[#allocation5 + $0x2d8] sm:$0xff]   ;;  %v6888_v34 = vld [vmem:[#allocation5 + $0x220] sm:$0xff]  }
  0x55   :  { %v6889_v35 = vld [vmem:[#allocation5 + $0x2a0] sm:$0xff]   ;;  %v6890_v36 = vld [vmem:[#allocation5 + $0x268] sm:$0xff]  }
  0x56   :  { %6111 = vmatpush3.bf16.msra.mxu0 %v6836_v30  ;;  %v6884_v30 = vld [vmem:[#allocation5 + $0x218] sm:$0xff]   ;;  %v6892_v38 = vld [vmem:[#allocation5 + $0x228] sm:$0xff]   ;;  %v6918_v8 = vld [vmem:[#allocation5 + $0x360] sm:$0xff]  }
  0x57   :  { %6133 = vmatpush3.bf16.msra.mxu1 %v6837_v31  ;;  %6140 = vmatprep.subr.bf16.mxu0 %v6838_v40  ;;  %v6885_v31 = vld [vmem:[#allocation5 + $0x298] sm:$0xff]   ;;  %v6894_v40 = vld [vmem:[#allocation5 + $0x270] sm:$0xff]   ;;  %v6919_v9 = vld [vmem:[#allocation5 + $0x3e0] sm:$0xff]  }
  0x58   :  { %6162 = vmatprep.subr.bf16.mxu1 %v6839_v41  ;;  %v6895_v41 = vld [vmem:[#allocation5 + $0x2f0] sm:$0xff]   ;;  %v6922_v12 = vld [vmem:[#allocation5 + $0x368] sm:$0xff]  }
  0x59   :  { %4310 = vmatmul.mubr.bf16.vlgmr.msra.gmra.mrb[0].mxu0 %v117_v37  ;;  %v6891_v37 = vld [vmem:[#allocation5 + $0x2e8] sm:$0xff]  }
  0x5a   :  { %4350 = vmatmul.mubr.bf16.vlgmr.msra.gmra.mrb[0].mxu1 %v119_v39  ;;  %6141 = vmatpush3.bf16.msra.mxu0 %v6840_v42  ;;  %v6893_v39 = vld [vmem:[#allocation5 + $0x2a8] sm:$0xff]   ;;  %v6896_v42 = vld [vmem:[#allocation5 + $0x230] sm:$0xff]  }
  0x5b   :  { %6163 = vmatpush3.bf16.msra.mxu1 %v6841_v43  ;;  %6142 = vmatprep.subr.bf16.mxu0 %v6842_v44  ;;  %v6897_v43 = vld [vmem:[#allocation5 + $0x2b0] sm:$0xff]   ;;  %v6898_v44 = vld [vmem:[#allocation5 + $0x278] sm:$0xff]   ;;  %v6923_v13 = vld [vmem:[#allocation5 + $0x3e8] sm:$0xff]  }
  0x5c   :  { %6164 = vmatprep.subr.bf16.mxu1 %v6843_v45  ;;  %4389 = vmatprep.mubr.bf16.mxu0 %v122_v10  ;;  %v6899_v45 = vld [vmem:[#allocation5 + $0x2f8] sm:$0xff]   ;;  %v6920_v10 = vld [vmem:[#allocation5 + $0x320] sm:$0xff]  }
  0x5d   :  { %4429 = vmatprep.mubr.bf16.mxu1 %v124_v11  ;;  %v6921_v11 = vld [vmem:[#allocation5 + $0x3a0] sm:$0xff]  }
  0x5e   :  { %6143 = vmatpush3.bf16.msra.mxu0 %v6844_v46  ;;  %v6900_v46 = vld [vmem:[#allocation5 + $0x238] sm:$0xff]  }
  0x5f   :  { %6165 = vmatpush3.bf16.msra.mxu1 %v6845_v47  ;;  %6144 = vmatprep.subr.bf16.mxu0 %v6846_v48  ;;  %v6901_v47 = vld [vmem:[#allocation5 + $0x2b8] sm:$0xff]   ;;  %v62_v48 = vld [vmem:[#allocation2 + $0x48] sm:$0xff] }
  0x60   :  { %6166 = vmatprep.subr.bf16.mxu1 %v6847_v49  ;;  %v126_v49 = vpack.c.bf16 %v62_v48, %v62_v48  ;;  %v6950_v48 = vld [vmem:[#allocation5 + $0x460] sm:$0xff]  }
  0x62   :  { %6145 = vmatpush3.bf16.msra.mxu0 %v6848_v50  ;;  %v64_v50 = vld [vmem:[#allocation2 + $0x58] sm:$0xff] }
  0x63   :  { %6167 = vmatpush3.bf16.msra.mxu1 %v6849_v51  ;;  %6146 = vmatprep.subr.bf16.mxu0 %v6850_v52  ;;  %v61_v51 = vld [vmem:[#allocation2 + $0x40] sm:$0xff]  ;;  %v63_v52 = vld [vmem:[#allocation2 + $0x50] sm:$0xff] }
  0x64   :  { %6168 = vmatprep.subr.bf16.mxu1 %v6851_v53  ;;  %v128_v53 = vpack.c.bf16 %v64_v50, %v64_v50  ;;  %v6952_v50 = vld [vmem:[#allocation5 + $0x420] sm:$0xff]  }
  0x66   :  { %6147 = vmatpush3.bf16.msra.mxu0 %v6852_v54  ;;  %v125_v54 = vpack.c.bf16 %v61_v51, %v61_v51  ;;  %v6953_v51 = vld [vmem:[#allocation5 + $0x4a0] sm:$0xff]  }
  0x67   :  { %6169 = vmatpush3.bf16.msra.mxu1 %v6853_v55  ;;  %6148 = vmatprep.subr.bf16.mxu0 %v6854_v56  ;;  %v127_v55 = vpack.c.bf16 %v63_v52, %v63_v52  ;;  %v6902_v56 = vld [vmem:[#allocation5 + $0x340] sm:$0xff]   ;;  %v6954_v52 = vld [vmem:[#allocation5 + $0x468] sm:$0xff]  }
  0x68   :  { %6170 = vmatprep.subr.bf16.mxu1 %v6855_v57  ;;  %v6903_v57 = vld [vmem:[#allocation5 + $0x3c0] sm:$0xff]  }
  0x6a   :  { %6149 = vmatpush3.bf16.msra.mxu0 %v6856_v58  ;;  %v6904_v58 = vld [vmem:[#allocation5 + $0x300] sm:$0xff]  }
  0x6b   :  { %6171 = vmatpush3.bf16.msra.mxu1 %v6857_v59  ;;  %6150 = vmatprep.subr.bf16.mxu0 %v6858_v60  ;;  %v6905_v59 = vld [vmem:[#allocation5 + $0x380] sm:$0xff]   ;;  %v6906_v60 = vld [vmem:[#allocation5 + $0x348] sm:$0xff]  }
  0x6c   :  { %6172 = vmatprep.subr.bf16.mxu1 %v6859_v61  ;;  %v6907_v61 = vld [vmem:[#allocation5 + $0x3c8] sm:$0xff]  }
  0x6e   :  { %6151 = vmatpush3.bf16.msra.mxu0 %v6860_v62  ;;  %v6908_v62 = vld [vmem:[#allocation5 + $0x308] sm:$0xff]  }
  0x6f   :  { %6173 = vmatpush3.bf16.msra.mxu1 %v6861_v63  ;;  %6152 = vmatprep.subr.bf16.mxu0 %v6862_v0  ;;  %v6909_v63 = vld [vmem:[#allocation5 + $0x388] sm:$0xff]   ;;  %v6910_v0 = vld [vmem:[#allocation5 + $0x350] sm:$0xff]  }
  0x70   :  { %6174 = vmatprep.subr.bf16.mxu1 %v6863_v1  ;;  %v6911_v1 = vld [vmem:[#allocation5 + $0x3d0] sm:$0xff]  }
  0x72   :  { %6153 = vmatpush3.bf16.msra.mxu0 %v6864_v2  ;;  %v6912_v2 = vld [vmem:[#allocation5 + $0x310] sm:$0xff]  }
  0x73   :  { %6175 = vmatpush3.bf16.msra.mxu1 %v6865_v3  ;;  %6154 = vmatprep.subr.bf16.mxu0 %v6866_v4  ;;  %v6913_v3 = vld [vmem:[#allocation5 + $0x390] sm:$0xff]   ;;  %v6914_v4 = vld [vmem:[#allocation5 + $0x358] sm:$0xff]  }
  0x74   :  { %6176 = vmatprep.subr.bf16.mxu1 %v6867_v5  ;;  %v6915_v5 = vld [vmem:[#allocation5 + $0x3d8] sm:$0xff]  }
  0x76   :  { %6155 = vmatpush3.bf16.msra.mxu0 %v6868_v6  ;;  %v6916_v6 = vld [vmem:[#allocation5 + $0x318] sm:$0xff]  }
  0x77   :  { %6177 = vmatpush3.bf16.msra.mxu1 %v6869_v7  ;;  %6184 = vmatprep.subr.bf16.mxu0 %v6870_v16  ;;  %v6917_v7 = vld [vmem:[#allocation5 + $0x398] sm:$0xff]   ;;  %v6926_v16 = vld [vmem:[#allocation5 + $0x370] sm:$0xff]  }
  0x78   :  { %6206 = vmatprep.subr.bf16.mxu1 %v6871_v17  ;;  %v6927_v17 = vld [vmem:[#allocation5 + $0x3f0] sm:$0xff]  }
  0x79   :  { %4390 = vmatmul.mubr.bf16.vlgmr.msra.gmra.mrb[4].mxu0 %v121_v14  ;;  %v6924_v14 = vld [vmem:[#allocation5 + $0x328] sm:$0xff]  }
  0x7a   :  { %4430 = vmatmul.mubr.bf16.vlgmr.msra.gmra.mrb[4].mxu1 %v123_v15  ;;  %6185 = vmatpush3.bf16.msra.mxu0 %v6872_v18  ;;  %v6925_v15 = vld [vmem:[#allocation5 + $0x3a8] sm:$0xff]   ;;  %v6928_v18 = vld [vmem:[#allocation5 + $0x330] sm:$0xff]  }
  0x7b   :  { %6207 = vmatpush3.bf16.msra.mxu1 %v6873_v19  ;;  %6186 = vmatprep.subr.bf16.mxu0 %v6874_v20  ;;  %v6929_v19 = vld [vmem:[#allocation5 + $0x3b0] sm:$0xff]   ;;  %v6930_v20 = vld [vmem:[#allocation5 + $0x378] sm:$0xff]  }
  0x7c   :  { %6208 = vmatprep.subr.bf16.mxu1 %v6875_v21  ;;  %4469 = vmatprep.mubr.bf16.mxu0 %v126_v49  ;;  %v6931_v21 = vld [vmem:[#allocation5 + $0x3f8] sm:$0xff]   ;;  %v6951_v49 = vld [vmem:[#allocation5 + $0x4e0] sm:$0xff]  }
  0x7d   :  { %4509 = vmatprep.mubr.bf16.mxu1 %v128_v53  ;;  %v6955_v53 = vld [vmem:[#allocation5 + $0x4e8] sm:$0xff]  }
  0x7e   :  { %6187 = vmatpush3.bf16.msra.mxu0 %v6876_v22  ;;  %v6932_v22 = vld [vmem:[#allocation5 + $0x338] sm:$0xff]  }
  0x7f   :  { %6209 = vmatpush3.bf16.msra.mxu1 %v6877_v23  ;;  %6188 = vmatprep.subr.bf16.mxu0 %v6878_v24  ;;  %v6933_v23 = vld [vmem:[#allocation5 + $0x3b8] sm:$0xff]   ;;  %v66_v24 = vld [vmem:[#allocation2 + $0x68] sm:$0xff] }
  0x80   :  { %6210 = vmatprep.subr.bf16.mxu1 %v6879_v25  ;;  %v68_v25 = vld [vmem:[#allocation2 + $0x78] sm:$0xff] }
  0x82   :  { %6189 = vmatpush3.bf16.msra.mxu0 %v6880_v26  ;;  %v65_v26 = vld [vmem:[#allocation2 + $0x60] sm:$0xff] }
  0x83   :  { %6211 = vmatpush3.bf16.msra.mxu1 %v6881_v27  ;;  %6190 = vmatprep.subr.bf16.mxu0 %v6882_v28  ;;  %v130_v27 = vpack.c.bf16 %v66_v24, %v66_v24  ;;  %v132_v28 = vpack.c.bf16 %v68_v25, %v68_v25  ;;  %v6982_v24 = vld [vmem:[#allocation5 + $0x560] sm:$0xff]  }
  0x84   :  { %6212 = vmatprep.subr.bf16.mxu1 %v6883_v29  ;;  %v129_v29 = vpack.c.bf16 %v65_v26, %v65_v26  ;;  %v6983_v25 = vld [vmem:[#allocation5 + $0x5e0] sm:$0xff]  }
  0x85   :  { %v6984_v26 = vld [vmem:[#allocation5 + $0x520] sm:$0xff]  }
  0x86   :  { %6191 = vmatpush3.bf16.msra.mxu0 %v6884_v30  ;;  %v67_v30 = vld [vmem:[#allocation2 + $0x70] sm:$0xff] }
  0x87   :  { %6213 = vmatpush3.bf16.msra.mxu1 %v6885_v31  ;;  %6192 = vmatprep.subr.bf16.mxu0 %v6886_v32  ;;  %v131_v31 = vpack.c.bf16 %v67_v30, %v67_v30  ;;  %v6934_v32 = vld [vmem:[#allocation5 + $0x440] sm:$0xff]   ;;  %v6988_v30 = vld [vmem:[#allocation5 + $0x528] sm:$0xff]  }
  0x88   :  { %6214 = vmatprep.subr.bf16.mxu1 %v6887_v33  ;;  %v6935_v33 = vld [vmem:[#allocation5 + $0x4c0] sm:$0xff]  }
  0x8a   :  { %6193 = vmatpush3.bf16.msra.mxu0 %v6888_v34  ;;  %v6936_v34 = vld [vmem:[#allocation5 + $0x400] sm:$0xff]  }
  0x8b   :  { %6215 = vmatpush3.bf16.msra.mxu1 %v6889_v35  ;;  %6194 = vmatprep.subr.bf16.mxu0 %v6890_v36  ;;  %v6937_v35 = vld [vmem:[#allocation5 + $0x480] sm:$0xff]   ;;  %v6938_v36 = vld [vmem:[#allocation5 + $0x448] sm:$0xff]  }
  0x8c   :  { %6216 = vmatprep.subr.bf16.mxu1 %v6891_v37  ;;  %v6939_v37 = vld [vmem:[#allocation5 + $0x4c8] sm:$0xff]  }
  0x8e   :  { %6195 = vmatpush3.bf16.msra.mxu0 %v6892_v38  ;;  %v6940_v38 = vld [vmem:[#allocation5 + $0x408] sm:$0xff]  }
  0x8f   :  { %6217 = vmatpush3.bf16.msra.mxu1 %v6893_v39  ;;  %6196 = vmatprep.subr.bf16.mxu0 %v6894_v40  ;;  %v6941_v39 = vld [vmem:[#allocation5 + $0x488] sm:$0xff]   ;;  %v6942_v40 = vld [vmem:[#allocation5 + $0x450] sm:$0xff]  }
  0x90   :  { %6218 = vmatprep.subr.bf16.mxu1 %v6895_v41  ;;  %v6943_v41 = vld [vmem:[#allocation5 + $0x4d0] sm:$0xff]  }
  0x92   :  { %6197 = vmatpush3.bf16.msra.mxu0 %v6896_v42  ;;  %v6944_v42 = vld [vmem:[#allocation5 + $0x410] sm:$0xff]  }
  0x93   :  { %6219 = vmatpush3.bf16.msra.mxu1 %v6897_v43  ;;  %6198 = vmatprep.subr.bf16.mxu0 %v6898_v44  ;;  %v6945_v43 = vld [vmem:[#allocation5 + $0x490] sm:$0xff]   ;;  %v6946_v44 = vld [vmem:[#allocation5 + $0x458] sm:$0xff]  }
  0x94   :  { %6220 = vmatprep.subr.bf16.mxu1 %v6899_v45  ;;  %v6947_v45 = vld [vmem:[#allocation5 + $0x4d8] sm:$0xff]  }
  0x96   :  { %6199 = vmatpush3.bf16.msra.mxu0 %v6900_v46  ;;  %v6948_v46 = vld [vmem:[#allocation5 + $0x418] sm:$0xff]  }
  0x97   :  { %6221 = vmatpush3.bf16.msra.mxu1 %v6901_v47  ;;  %6228 = vmatprep.subr.bf16.mxu0 %v6902_v56  ;;  %v6949_v47 = vld [vmem:[#allocation5 + $0x498] sm:$0xff]   ;;  %v6958_v56 = vld [vmem:[#allocation5 + $0x470] sm:$0xff]  }
  0x98   :  { %6250 = vmatprep.subr.bf16.mxu1 %v6903_v57  ;;  %v6959_v57 = vld [vmem:[#allocation5 + $0x4f0] sm:$0xff]  }
  0x99   :  { %4470 = vmatmul.mubr.bf16.vlgmr.msra.gmra.mrb[8].mxu0 %v125_v54  ;;  %v6956_v54 = vld [vmem:[#allocation5 + $0x428] sm:$0xff]  }
  0x9a   :  { %4510 = vmatmul.mubr.bf16.vlgmr.msra.gmra.mrb[8].mxu1 %v127_v55  ;;  %6229 = vmatpush3.bf16.msra.mxu0 %v6904_v58  ;;  %v6957_v55 = vld [vmem:[#allocation5 + $0x4a8] sm:$0xff]   ;;  %v6960_v58 = vld [vmem:[#allocation5 + $0x430] sm:$0xff]  }
  0x9b   :  { %6251 = vmatpush3.bf16.msra.mxu1 %v6905_v59  ;;  %6230 = vmatprep.subr.bf16.mxu0 %v6906_v60  ;;  %v6961_v59 = vld [vmem:[#allocation5 + $0x4b0] sm:$0xff]   ;;  %v6962_v60 = vld [vmem:[#allocation5 + $0x478] sm:$0xff]  }
  0x9c   :  { %6252 = vmatprep.subr.bf16.mxu1 %v6907_v61  ;;  %4549 = vmatprep.mubr.bf16.mxu0 %v130_v27  ;;  %v6963_v61 = vld [vmem:[#allocation5 + $0x4f8] sm:$0xff]   ;;  %v6985_v27 = vld [vmem:[#allocation5 + $0x5a0] sm:$0xff]  }
  0x9d   :  { %4589 = vmatprep.mubr.bf16.mxu1 %v132_v28  ;;  %v6986_v28 = vld [vmem:[#allocation5 + $0x568] sm:$0xff]  }
  0x9e   :  { %6231 = vmatpush3.bf16.msra.mxu0 %v6908_v62  ;;  %v6964_v62 = vld [vmem:[#allocation5 + $0x438] sm:$0xff]  }
  0x9f   :  { %6253 = vmatpush3.bf16.msra.mxu1 %v6909_v63  ;;  %6232 = vmatprep.subr.bf16.mxu0 %v6910_v0  ;;  %v6965_v63 = vld [vmem:[#allocation5 + $0x4b8] sm:$0xff]   ;;  %v70_v0 = vld [vmem:[#allocation2 + $0x88] sm:$0xff] }
  0xa0   :  { %6254 = vmatprep.subr.bf16.mxu1 %v6911_v1  ;;  %v72_v1 = vld [vmem:[#allocation2 + $0x98] sm:$0xff] }
  0xa2   :  { %6233 = vmatpush3.bf16.msra.mxu0 %v6912_v2  ;;  %v134_v2 = vpack.c.bf16 %v70_v0, %v70_v0  ;;  %v7014_v0 = vld [vmem:[#allocation5 + $0x660] sm:$0xff]  }
  0xa3   :  { %6255 = vmatpush3.bf16.msra.mxu1 %v6913_v3  ;;  %6234 = vmatprep.subr.bf16.mxu0 %v6914_v4  ;;  %v136_v3 = vpack.c.bf16 %v72_v1, %v72_v1  ;;  %v69_v4 = vld [vmem:[#allocation2 + $0x80] sm:$0xff] }
  0xa4   :  { %6256 = vmatprep.subr.bf16.mxu1 %v6915_v5  ;;  %v71_v5 = vld [vmem:[#allocation2 + $0x90] sm:$0xff]  ;;  %v7015_v1 = vld [vmem:[#allocation5 + $0x6e0] sm:$0xff]  }
  0xa6   :  { %6235 = vmatpush3.bf16.msra.mxu0 %v6916_v6  ;;  %v133_v6 = vpack.c.bf16 %v69_v4, %v69_v4  ;;  %v7018_v4 = vld [vmem:[#allocation5 + $0x668] sm:$0xff]  }
  0xa7   :  { %6257 = vmatpush3.bf16.msra.mxu1 %v6917_v7  ;;  %6236 = vmatprep.subr.bf16.mxu0 %v6918_v8  ;;  %v135_v7 = vpack.c.bf16 %v71_v5, %v71_v5  ;;  %v6966_v8 = vld [vmem:[#allocation5 + $0x540] sm:$0xff]   ;;  %v7019_v5 = vld [vmem:[#allocation5 + $0x6e8] sm:$0xff]  }
  0xa8   :  { %6258 = vmatprep.subr.bf16.mxu1 %v6919_v9  ;;  %v6967_v9 = vld [vmem:[#allocation5 + $0x5c0] sm:$0xff]  }
  0xaa   :  { %6237 = vmatpush3.bf16.msra.mxu0 %v6920_v10  ;;  %v6968_v10 = vld [vmem:[#allocation5 + $0x500] sm:$0xff]  }
  0xab   :  { %6259 = vmatpush3.bf16.msra.mxu1 %v6921_v11  ;;  %6238 = vmatprep.subr.bf16.mxu0 %v6922_v12  ;;  %v6969_v11 = vld [vmem:[#allocation5 + $0x580] sm:$0xff]   ;;  %v6970_v12 = vld [vmem:[#allocation5 + $0x548] sm:$0xff]  }
  0xac   :  { %6260 = vmatprep.subr.bf16.mxu1 %v6923_v13  ;;  %v6971_v13 = vld [vmem:[#allocation5 + $0x5c8] sm:$0xff]  }
  0xae   :  { %6239 = vmatpush3.bf16.msra.mxu0 %v6924_v14  ;;  %v6972_v14 = vld [vmem:[#allocation5 + $0x508] sm:$0xff]  }
  0xaf   :  { %6261 = vmatpush3.bf16.msra.mxu1 %v6925_v15  ;;  %6240 = vmatprep.subr.bf16.mxu0 %v6926_v16  ;;  %v6973_v15 = vld [vmem:[#allocation5 + $0x588] sm:$0xff]   ;;  %v6974_v16 = vld [vmem:[#allocation5 + $0x550] sm:$0xff]  }
  0xb0   :  { %6262 = vmatprep.subr.bf16.mxu1 %v6927_v17  ;;  %v6975_v17 = vld [vmem:[#allocation5 + $0x5d0] sm:$0xff]  }
  0xb2   :  { %6241 = vmatpush3.bf16.msra.mxu0 %v6928_v18  ;;  %v6976_v18 = vld [vmem:[#allocation5 + $0x510] sm:$0xff]  }
  0xb3   :  { %6263 = vmatpush3.bf16.msra.mxu1 %v6929_v19  ;;  %6242 = vmatprep.subr.bf16.mxu0 %v6930_v20  ;;  %v6977_v19 = vld [vmem:[#allocation5 + $0x590] sm:$0xff]   ;;  %v6978_v20 = vld [vmem:[#allocation5 + $0x558] sm:$0xff]  }
  0xb4   :  { %6264 = vmatprep.subr.bf16.mxu1 %v6931_v21  ;;  %v6979_v21 = vld [vmem:[#allocation5 + $0x5d8] sm:$0xff]  }
  0xb6   :  { %6243 = vmatpush3.bf16.msra.mxu0 %v6932_v22  ;;  %v6980_v22 = vld [vmem:[#allocation5 + $0x518] sm:$0xff]  }
  0xb7   :  { %6265 = vmatpush3.bf16.msra.mxu1 %v6933_v23  ;;  %6272 = vmatprep.subr.bf16.mxu0 %v6934_v32  ;;  %v6981_v23 = vld [vmem:[#allocation5 + $0x598] sm:$0xff]   ;;  %v6990_v32 = vld [vmem:[#allocation5 + $0x570] sm:$0xff]  }
  0xb8   :  { %6294 = vmatprep.subr.bf16.mxu1 %v6935_v33  ;;  %v6991_v33 = vld [vmem:[#allocation5 + $0x5f0] sm:$0xff]  }
  0xb9   :  { %4550 = vmatmul.mubr.bf16.vlgmr.msra.gmra.mrb[12].mxu0 %v129_v29  ;;  %v6987_v29 = vld [vmem:[#allocation5 + $0x5e8] sm:$0xff]  }
  0xba   :  { %4590 = vmatmul.mubr.bf16.vlgmr.msra.gmra.mrb[12].mxu1 %v131_v31  ;;  %6273 = vmatpush3.bf16.msra.mxu0 %v6936_v34  ;;  %v6989_v31 = vld [vmem:[#allocation5 + $0x5a8] sm:$0xff]   ;;  %v6992_v34 = vld [vmem:[#allocation5 + $0x530] sm:$0xff]  }
  0xbb   :  { %6295 = vmatpush3.bf16.msra.mxu1 %v6937_v35  ;;  %6274 = vmatprep.subr.bf16.mxu0 %v6938_v36  ;;  %v6993_v35 = vld [vmem:[#allocation5 + $0x5b0] sm:$0xff]   ;;  %v6994_v36 = vld [vmem:[#allocation5 + $0x578] sm:$0xff]  }
  0xbc   :  { %6296 = vmatprep.subr.bf16.mxu1 %v6939_v37  ;;  %4629 = vmatprep.mubr.bf16.mxu0 %v134_v2  ;;  %v6995_v37 = vld [vmem:[#allocation5 + $0x5f8] sm:$0xff]   ;;  %v7016_v2 = vld [vmem:[#allocation5 + $0x620] sm:$0xff]  }
  0xbd   :  { %4669 = vmatprep.mubr.bf16.mxu1 %v136_v3  ;;  %v7017_v3 = vld [vmem:[#allocation5 + $0x6a0] sm:$0xff]  }
  0xbe   :  { %6275 = vmatpush3.bf16.msra.mxu0 %v6940_v38  ;;  %v6996_v38 = vld [vmem:[#allocation5 + $0x538] sm:$0xff]  }
  0xbf   :  { %6297 = vmatpush3.bf16.msra.mxu1 %v6941_v39  ;;  %6276 = vmatprep.subr.bf16.mxu0 %v6942_v40  ;;  %v6997_v39 = vld [vmem:[#allocation5 + $0x5b8] sm:$0xff]   ;;  %v74_v40 = vld [vmem:[#allocation2 + $0xa8] sm:$0xff] }
  0xc0   :  { %6298 = vmatprep.subr.bf16.mxu1 %v6943_v41  ;;  %v138_v41 = vpack.c.bf16 %v74_v40, %v74_v40 }
  0xc2   :  { %6277 = vmatpush3.bf16.msra.mxu0 %v6944_v42  ;;  %v76_v42 = vld [vmem:[#allocation2 + $0xb8] sm:$0xff] }
  0xc3   :  { %6299 = vmatpush3.bf16.msra.mxu1 %v6945_v43  ;;  %6278 = vmatprep.subr.bf16.mxu0 %v6946_v44  ;;  %v73_v43 = vld [vmem:[#allocation2 + $0xa0] sm:$0xff]  ;;  %v75_v44 = vld [vmem:[#allocation2 + $0xb0] sm:$0xff] }
  0xc4   :  { %6300 = vmatprep.subr.bf16.mxu1 %v6947_v45  ;;  %v140_v45 = vpack.c.bf16 %v76_v42, %v76_v42 }
  0xc6   :  { %6279 = vmatpush3.bf16.msra.mxu0 %v6948_v46  ;;  %v137_v46 = vpack.c.bf16 %v73_v43, %v73_v43  ;;  %v7046_v43 = vld [vmem:[#allocation5 + $0x760] sm:$0xff]  }
  0xc7   :  { %6301 = vmatpush3.bf16.msra.mxu1 %v6949_v47  ;;  %6280 = vmatprep.subr.bf16.mxu0 %v6950_v48  ;;  %v139_v47 = vpack.c.bf16 %v75_v44, %v75_v44  ;;  %v6998_v48 = vld [vmem:[#allocation5 + $0x640] sm:$0xff]  }
  0xc8   :  { %6302 = vmatprep.subr.bf16.mxu1 %v6951_v49  ;;  %v6999_v49 = vld [vmem:[#allocation5 + $0x6c0] sm:$0xff]  }
  0xca   :  { %6281 = vmatpush3.bf16.msra.mxu0 %v6952_v50  ;;  %v7000_v50 = vld [vmem:[#allocation5 + $0x600] sm:$0xff]  }
  0xcb   :  { %6303 = vmatpush3.bf16.msra.mxu1 %v6953_v51  ;;  %6282 = vmatprep.subr.bf16.mxu0 %v6954_v52  ;;  %v7001_v51 = vld [vmem:[#allocation5 + $0x680] sm:$0xff]   ;;  %v7002_v52 = vld [vmem:[#allocation5 + $0x648] sm:$0xff]  }
  0xcc   :  { %6304 = vmatprep.subr.bf16.mxu1 %v6955_v53  ;;  %v7003_v53 = vld [vmem:[#allocation5 + $0x6c8] sm:$0xff]  }
  0xce   :  { %6283 = vmatpush3.bf16.msra.mxu0 %v6956_v54  ;;  %v7004_v54 = vld [vmem:[#allocation5 + $0x608] sm:$0xff]  }
  0xcf   :  { %6305 = vmatpush3.bf16.msra.mxu1 %v6957_v55  ;;  %6284 = vmatprep.subr.bf16.mxu0 %v6958_v56  ;;  %v7005_v55 = vld [vmem:[#allocation5 + $0x688] sm:$0xff]   ;;  %v7006_v56 = vld [vmem:[#allocation5 + $0x650] sm:$0xff]  }
  0xd0   :  { %6306 = vmatprep.subr.bf16.mxu1 %v6959_v57  ;;  %v7007_v57 = vld [vmem:[#allocation5 + $0x6d0] sm:$0xff]  }
  0xd2   :  { %6285 = vmatpush3.bf16.msra.mxu0 %v6960_v58  ;;  %v7008_v58 = vld [vmem:[#allocation5 + $0x610] sm:$0xff]  }
  0xd3   :  { %6307 = vmatpush3.bf16.msra.mxu1 %v6961_v59  ;;  %6286 = vmatprep.subr.bf16.mxu0 %v6962_v60  ;;  %v7009_v59 = vld [vmem:[#allocation5 + $0x690] sm:$0xff]   ;;  %v7010_v60 = vld [vmem:[#allocation5 + $0x658] sm:$0xff]  }
  0xd4   :  { %6308 = vmatprep.subr.bf16.mxu1 %v6963_v61  ;;  %v7011_v61 = vld [vmem:[#allocation5 + $0x6d8] sm:$0xff]  }
  0xd6   :  { %6287 = vmatpush3.bf16.msra.mxu0 %v6964_v62  ;;  %v7012_v62 = vld [vmem:[#allocation5 + $0x618] sm:$0xff]  }
  0xd7   :  { %6309 = vmatpush3.bf16.msra.mxu1 %v6965_v63  ;;  %6316 = vmatprep.subr.bf16.mxu0 %v6966_v8  ;;  %v7013_v63 = vld [vmem:[#allocation5 + $0x698] sm:$0xff]   ;;  %v7022_v8 = vld [vmem:[#allocation5 + $0x670] sm:$0xff]  }
  0xd8   :  { %6338 = vmatprep.subr.bf16.mxu1 %v6967_v9  ;;  %v7023_v9 = vld [vmem:[#allocation5 + $0x6f0] sm:$0xff]  }
  0xd9   :  { %4630 = vmatmul.mubr.bf16.vlgmr.msra.gmra.mrb[16].mxu0 %v133_v6  ;;  %v7020_v6 = vld [vmem:[#allocation5 + $0x628] sm:$0xff]  }
  0xda   :  { %4670 = vmatmul.mubr.bf16.vlgmr.msra.gmra.mrb[16].mxu1 %v135_v7  ;;  %6317 = vmatpush3.bf16.msra.mxu0 %v6968_v10  ;;  %v7021_v7 = vld [vmem:[#allocation5 + $0x6a8] sm:$0xff]   ;;  %v7024_v10 = vld [vmem:[#allocation5 + $0x630] sm:$0xff]  }
  0xdb   :  { %6339 = vmatpush3.bf16.msra.mxu1 %v6969_v11  ;;  %6318 = vmatprep.subr.bf16.mxu0 %v6970_v12  ;;  %v7025_v11 = vld [vmem:[#allocation5 + $0x6b0] sm:$0xff]   ;;  %v7026_v12 = vld [vmem:[#allocation5 + $0x678] sm:$0xff]  }
  0xdc   :  { %6340 = vmatprep.subr.bf16.mxu1 %v6971_v13  ;;  %4709 = vmatprep.mubr.bf16.mxu0 %v138_v41  ;;  %v7027_v13 = vld [vmem:[#allocation5 + $0x6f8] sm:$0xff]  }
  0xdd   :  { %4749 = vmatprep.mubr.bf16.mxu1 %v140_v45  ;;  %v7045_v41 = vld [vmem:[#allocation5 + $0x798] sm:$0xff]  }
  0xde   :  { %6319 = vmatpush3.bf16.msra.mxu0 %v6972_v14  ;;  %v7028_v14 = vld [vmem:[#allocation5 + $0x638] sm:$0xff]  }
  0xdf   :  { %6341 = vmatpush3.bf16.msra.mxu1 %v6973_v15  ;;  %6320 = vmatprep.subr.bf16.mxu0 %v6974_v16  ;;  %v7029_v15 = vld [vmem:[#allocation5 + $0x6b8] sm:$0xff]   ;;  %v78_v16 = vld [vmem:[#allocation2 + $0xc8] sm:$0xff] }
  0xe0   :  { %6342 = vmatprep.subr.bf16.mxu1 %v6975_v17  ;;  %v80_v17 = vld [vmem:[#allocation2 + $0xd8] sm:$0xff] }
  0xe2   :  { %6321 = vmatpush3.bf16.msra.mxu0 %v6976_v18  ;;  %v77_v18 = vld [vmem:[#allocation2 + $0xc0] sm:$0xff] }
  0xe3   :  { %6343 = vmatpush3.bf16.msra.mxu1 %v6977_v19  ;;  %6322 = vmatprep.subr.bf16.mxu0 %v6978_v20  ;;  %v142_v19 = vpack.c.bf16 %v78_v16, %v78_v16  ;;  %v144_v20 = vpack.c.bf16 %v80_v17, %v80_v17  ;;  %v7067_v16 = vld [vmem:[#allocation5 + $0x8c8] sm:$0xff]  }
  0xe4   :  { %6344 = vmatprep.subr.bf16.mxu1 %v6979_v21  ;;  %v141_v21 = vpack.c.bf16 %v77_v18, %v77_v18  ;;  %v7068_v17 = vld [vmem:[#allocation5 + $0x808] sm:$0xff]  }
  0xe5   :  { %v7069_v18 = vld [vmem:[#allocation5 + $0x888] sm:$0xff]  }
  0xe6   :  { %6323 = vmatpush3.bf16.msra.mxu0 %v6980_v22  ;;  %v79_v22 = vld [vmem:[#allocation2 + $0xd0] sm:$0xff] }
  0xe7   :  { %6345 = vmatpush3.bf16.msra.mxu1 %v6981_v23  ;;  %6324 = vmatprep.subr.bf16.mxu0 %v6982_v24  ;;  %v143_v23 = vpack.c.bf16 %v79_v22, %v79_v22  ;;  %v7030_v24 = vld [vmem:[#allocation5 + $0x740] sm:$0xff]   ;;  %v7073_v22 = vld [vmem:[#allocation5 + $0x890] sm:$0xff]  }
  0xe8   :  { %6346 = vmatprep.subr.bf16.mxu1 %v6983_v25  ;;  %v7031_v25 = vld [vmem:[#allocation5 + $0x7c0] sm:$0xff]  }
  0xea   :  { %6325 = vmatpush3.bf16.msra.mxu0 %v6984_v26  ;;  %v7032_v26 = vld [vmem:[#allocation5 + $0x700] sm:$0xff]  }
  0xeb   :  { %6347 = vmatpush3.bf16.msra.mxu1 %v6985_v27  ;;  %6326 = vmatprep.subr.bf16.mxu0 %v6986_v28  ;;  %v7033_v27 = vld [vmem:[#allocation5 + $0x780] sm:$0xff]   ;;  %v7034_v28 = vld [vmem:[#allocation5 + $0x748] sm:$0xff]  }
  0xec   :  { %6348 = vmatprep.subr.bf16.mxu1 %v6987_v29  ;;  %v7035_v29 = vld [vmem:[#allocation5 + $0x7c8] sm:$0xff]  }
  0xee   :  { %6327 = vmatpush3.bf16.msra.mxu0 %v6988_v30  ;;  %v7036_v30 = vld [vmem:[#allocation5 + $0x708] sm:$0xff]  }
  0xef   :  { %6349 = vmatpush3.bf16.msra.mxu1 %v6989_v31  ;;  %6328 = vmatprep.subr.bf16.mxu0 %v6990_v32  ;;  %v7037_v31 = vld [vmem:[#allocation5 + $0x788] sm:$0xff]   ;;  %v7038_v32 = vld [vmem:[#allocation5 + $0x750] sm:$0xff]  }
  0xf0   :  { %6350 = vmatprep.subr.bf16.mxu1 %v6991_v33  ;;  %v7039_v33 = vld [vmem:[#allocation5 + $0x7d0] sm:$0xff]  }
  0xf2   :  { %6329 = vmatpush3.bf16.msra.mxu0 %v6992_v34  ;;  %v7040_v34 = vld [vmem:[#allocation5 + $0x710] sm:$0xff]  }
  0xf3   :  { %6351 = vmatpush3.bf16.msra.mxu1 %v6993_v35  ;;  %6330 = vmatprep.subr.bf16.mxu0 %v6994_v36  ;;  %v7041_v35 = vld [vmem:[#allocation5 + $0x790] sm:$0xff]   ;;  %v7042_v36 = vld [vmem:[#allocation5 + $0x758] sm:$0xff]  }
  0xf4   :  { %6352 = vmatprep.subr.bf16.mxu1 %v6995_v37  ;;  %v7043_v37 = vld [vmem:[#allocation5 + $0x7d8] sm:$0xff]  }
  0xf6   :  { %6331 = vmatpush3.bf16.msra.mxu0 %v6996_v38 }
  0xf7   :  { %6353 = vmatpush3.bf16.msra.mxu1 %v6997_v39  ;;  %6360 = vmatprep.subr.bf16.mxu0 %v6998_v48  ;;  %v7044_v39 = vld [vmem:[#allocation5 + $0x718] sm:$0xff]  }
  0xf8   :  { %6382 = vmatprep.subr.bf16.mxu1 %v6999_v49  ;;  %v7048_v49 = vld [vmem:[#allocation5 + $0x720] sm:$0xff]  }
  0xf9   :  { %4710 = vmatmul.mubr.bf16.vlgmr.msra.gmra.mrb[20].mxu0 %v137_v46  ;;  %v7047_v46 = vld [vmem:[#allocation5 + $0x7e0] sm:$0xff]  }
  0xfa   :  { %4750 = vmatmul.mubr.bf16.vlgmr.msra.gmra.mrb[20].mxu1 %v139_v47  ;;  %6361 = vmatpush3.bf16.msra.mxu0 %v7000_v50 }
  0xfb   :  { %6383 = vmatpush3.bf16.msra.mxu1 %v7001_v51  ;;  %6362 = vmatprep.subr.bf16.mxu0 %v7002_v52  ;;  %v7049_v51 = vld [vmem:[#allocation5 + $0x7a0] sm:$0xff]  }
  0xfc   :  { %6384 = vmatprep.subr.bf16.mxu1 %v7003_v53  ;;  %4789 = vmatprep.mubr.bf16.mxu0 %v142_v19  ;;  %v7070_v19 = vld [vmem:[#allocation5 + $0x850] sm:$0xff]  }
  0xfd   :  { %4829 = vmatprep.mubr.bf16.mxu1 %v144_v20  ;;  %v7071_v20 = vld [vmem:[#allocation5 + $0x8d0] sm:$0xff]  }
  0xfe   :  { %6363 = vmatpush3.bf16.msra.mxu0 %v7004_v54  ;;  %v7050_v54 = vld [vmem:[#allocation5 + $0x768] sm:$0xff]  }
  0xff   :  { %6385 = vmatpush3.bf16.msra.mxu1 %v7005_v55  ;;  %6364 = vmatprep.subr.bf16.mxu0 %v7006_v56  ;;  %v7051_v56 = vld [vmem:[#allocation5 + $0x7e8] sm:$0xff]  }
 0x100   :  { %6386 = vmatprep.subr.bf16.mxu1 %v7007_v57  ;;  %v7052_v57 = vld [vmem:[#allocation5 + $0x728] sm:$0xff]  }
 0x102   :  { %6365 = vmatpush3.bf16.msra.mxu0 %v7008_v58  ;;  %v7053_v58 = vld [vmem:[#allocation5 + $0x7a8] sm:$0xff]  }
 0x103   :  { %6387 = vmatpush3.bf16.msra.mxu1 %v7009_v59  ;;  %6366 = vmatprep.subr.bf16.mxu0 %v7010_v60  ;;  %v7054_v59 = vld [vmem:[#allocation5 + $0x770] sm:$0xff]  }
 0x104   :  { %6388 = vmatprep.subr.bf16.mxu1 %v7011_v61  ;;  %v7055_v60 = vld [vmem:[#allocation5 + $0x7f0] sm:$0xff]  }
 0x105   :  { %v7056_v61 = vld [vmem:[#allocation5 + $0x730] sm:$0xff]  }
 0x106   :  { %6367 = vmatpush3.bf16.msra.mxu0 %v7012_v62  ;;  %v7057_v62 = vld [vmem:[#allocation5 + $0x7b0] sm:$0xff]  }
 0x107   :  { %6389 = vmatpush3.bf16.msra.mxu1 %v7013_v63  ;;  %6368 = vmatprep.subr.bf16.mxu0 %v7014_v0  ;;  %v7058_v63 = vld [vmem:[#allocation5 + $0x778] sm:$0xff]  }
 0x108   :  { %6390 = vmatprep.subr.bf16.mxu1 %v7015_v1  ;;  %v7059_v0 = vld [vmem:[#allocation5 + $0x7f8] sm:$0xff]  }
 0x109   :  { %v7060_v1 = vld [vmem:[#allocation5 + $0x738] sm:$0xff]  }
 0x10a   :  { %6369 = vmatpush3.bf16.msra.mxu0 %v7016_v2  ;;  %v7061_v2 = vld [vmem:[#allocation5 + $0x7b8] sm:$0xff]  }
 0x10b   :  { %6391 = vmatpush3.bf16.msra.mxu1 %v7017_v3  ;;  %6370 = vmatprep.subr.bf16.mxu0 %v7018_v4  ;;  %v82_v3 = vld [vmem:[#allocation2 + $0xe8] sm:$0xff]  ;;  %v84_v4 = vld [vmem:[#allocation2 + $0xf8] sm:$0xff] }
 0x10c   :  { %6392 = vmatprep.subr.bf16.mxu1 %v7019_v5  ;;  %v146_v5 = vpack.c.bf16 %v82_v3, %v82_v3  ;;  %v7098_v3 = vld [vmem:[#allocation5 + $0x948] sm:$0xff]  }
 0x10e   :  { %6371 = vmatpush3.bf16.msra.mxu0 %v7020_v6  ;;  %v148_v6 = vpack.c.bf16 %v84_v4, %v84_v4  ;;  %v7099_v4 = vld [vmem:[#allocation5 + $0x9c8] sm:$0xff]  }
 0x10f   :  { %6393 = vmatpush3.bf16.msra.mxu1 %v7021_v7  ;;  %6372 = vmatprep.subr.bf16.mxu0 %v7022_v8  ;;  %v81_v7 = vld [vmem:[#allocation2 + $0xe0] sm:$0xff]  ;;  %v83_v8 = vld [vmem:[#allocation2 + $0xf0] sm:$0xff] }
 0x110   :  { %6394 = vmatprep.subr.bf16.mxu1 %v7023_v9  ;;  %v145_v9 = vpack.c.bf16 %v81_v7, %v81_v7  ;;  %v7102_v7 = vld [vmem:[#allocation5 + $0x950] sm:$0xff]  }
 0x112   :  { %6373 = vmatpush3.bf16.msra.mxu0 %v7024_v10  ;;  %v147_v10 = vpack.c.bf16 %v83_v8, %v83_v8  ;;  %v7103_v8 = vld [vmem:[#allocation5 + $0x9d0] sm:$0xff]  }
 0x113   :  { %6395 = vmatpush3.bf16.msra.mxu1 %v7025_v11  ;;  %6374 = vmatprep.subr.bf16.mxu0 %v7026_v12  ;;  %v7062_v11 = vld [vmem:[#allocation5 + $0x840] sm:$0xff]  }
 0x114   :  { %6396 = vmatprep.subr.bf16.mxu1 %v7027_v13  ;;  %v7063_v12 = vld [vmem:[#allocation5 + $0x8c0] sm:$0xff]  }
 0x115   :  { %v7064_v13 = vld [vmem:[#allocation5 + $0x800] sm:$0xff]  }
 0x116   :  { %6375 = vmatpush3.bf16.msra.mxu0 %v7028_v14  ;;  %v7065_v14 = vld [vmem:[#allocation5 + $0x880] sm:$0xff]  }
 0x117   :  { %6397 = vmatpush3.bf16.msra.mxu1 %v7029_v15  ;;  %6404 = vmatprep.subr.bf16.mxu0 %v7030_v24  ;;  %v7066_v15 = vld [vmem:[#allocation5 + $0x848] sm:$0xff]   ;;  %v7075_v24 = vld [vmem:[#allocation5 + $0x8d8] sm:$0xff]  }
 0x118   :  { %6426 = vmatprep.subr.bf16.mxu1 %v7031_v25 }
 0x119   :  { %4790 = vmatmul.mubr.bf16.vlgmr.msra.gmra.mrb[24].mxu0 %v141_v21  ;;  %v7072_v21 = vld [vmem:[#allocation5 + $0x810] sm:$0xff]  }
 0x11a   :  { %4830 = vmatmul.mubr.bf16.vlgmr.msra.gmra.mrb[24].mxu1 %v143_v23  ;;  %6405 = vmatpush3.bf16.msra.mxu0 %v7032_v26  ;;  %v7074_v23 = vld [vmem:[#allocation5 + $0x858] sm:$0xff]  }
 0x11b   :  { %6427 = vmatpush3.bf16.msra.mxu1 %v7033_v27  ;;  %6406 = vmatprep.subr.bf16.mxu0 %v7034_v28  ;;  %v7076_v26 = vld [vmem:[#allocation5 + $0x818] sm:$0xff]  }
 0x11c   :  { %6428 = vmatprep.subr.bf16.mxu1 %v7035_v29  ;;  %4869 = vmatprep.mubr.bf16.mxu0 %v146_v5  ;;  %v7077_v28 = vld [vmem:[#allocation5 + $0x898] sm:$0xff]   ;;  %v7100_v5 = vld [vmem:[#allocation5 + $0x908] sm:$0xff]  }
 0x11d   :  { %4909 = vmatprep.mubr.bf16.mxu1 %v148_v6  ;;  %v7101_v6 = vld [vmem:[#allocation5 + $0x988] sm:$0xff]  }
 0x11e   :  { %6407 = vmatpush3.bf16.msra.mxu0 %v7036_v30  ;;  %v7078_v30 = vld [vmem:[#allocation5 + $0x860] sm:$0xff]  }
 0x11f   :  { %6429 = vmatpush3.bf16.msra.mxu1 %v7037_v31  ;;  %6408 = vmatprep.subr.bf16.mxu0 %v7038_v32 }
 0x120   :  { %6430 = vmatprep.subr.bf16.mxu1 %v7039_v33  ;;  %v7079_v33 = vld [vmem:[#allocation5 + $0x8e0] sm:$0xff]  }
 0x122   :  { %6409 = vmatpush3.bf16.msra.mxu0 %v7040_v34 }
 0x123   :  { %6431 = vmatpush3.bf16.msra.mxu1 %v7041_v35  ;;  %6410 = vmatprep.subr.bf16.mxu0 %v7042_v36  ;;  %v7080_v36 = vld [vmem:[#allocation5 + $0x820] sm:$0xff]  }
 0x124   :  { %6432 = vmatprep.subr.bf16.mxu1 %v7043_v37 }
 0x126   :  { %6411 = vmatpush3.bf16.msra.mxu0 %v7044_v39  ;;  %v7081_v39 = vld [vmem:[#allocation5 + $0x8a0] sm:$0xff]  }
 0x127   :  { %6433 = vmatpush3.bf16.msra.mxu1 %v7045_v41  ;;  %6412 = vmatprep.subr.bf16.mxu0 %v7046_v43 }
 0x128   :  { %6434 = vmatprep.subr.bf16.mxu1 %v7047_v46  ;;  %v7085_v46 = vld [vmem:[#allocation5 + $0x8a8] sm:$0xff]  }
 0x12a   :  { %6413 = vmatpush3.bf16.msra.mxu0 %v7048_v49  ;;  %v7088_v49 = vld [vmem:[#allocation5 + $0x830] sm:$0xff]  }
 0x12b   :  { %6435 = vmatpush3.bf16.msra.mxu1 %v7049_v51  ;;  %6414 = vmatprep.subr.bf16.mxu0 %v7050_v54  ;;  %v7090_v51 = vld [vmem:[#allocation5 + $0x878] sm:$0xff]  }
 0x12c   :  { %v6112_v38 = vpop.f32.mrb[0].mxu0  ;;  %6436 = vmatprep.subr.bf16.mxu1 %v7051_v56  ;;  %v7093_v54 = vld [vmem:[#allocation5 + $0x8b8] sm:$0xff]  }
 0x12d   :  { %v6134_v40 = vpop.f32.mrb[0].mxu1  ;;  %v6113_v42 = vpop.f32.mrb[1].mxu0 }
 0x12e   :  { %v6114_v44 = vadd.f32 %v6113_v42, %v6112_v38  ;;  %v6135_v45 = vpop.f32.mrb[1].mxu1  ;;  %v6115_v48 = vpop.f32.mrb[2].mxu0  ;;  %6415 = vmatpush3.bf16.msra.mxu0 %v7052_v57  ;;  %v7082_v42 = vld [vmem:[#allocation5 + $0x868] sm:$0xff]   ;;  %v88_v57 = vld [vmem:[#allocation2 + $0x118] sm:$0xff] }
 0x12f   :  { %v6136_v47 = vadd.f32 %v6135_v45, %v6134_v40  ;;  %v6137_v50 = vpop.f32.mrb[2].mxu1  ;;  %v6116_v53 = vpop.f32.mrb[3].mxu0  ;;  %6437 = vmatpush3.bf16.msra.mxu1 %v7053_v58  ;;  %6416 = vmatprep.subr.bf16.mxu0 %v7054_v59  ;;  %v7084_v45 = vld [vmem:[#allocation5 + $0x828] sm:$0xff]   ;;  %v7087_v48 = vld [vmem:[#allocation5 + $0x8f0] sm:$0xff]   ;;  %v85_v58 = vld [vmem:[#allocation2 + $0x100] sm:$0xff] }
 0x130   :  { %v6138_v55 = vpop.f32.mrb[3].mxu1  ;;  %6438 = vmatprep.subr.bf16.mxu1 %v7055_v60  ;;  %v7089_v50 = vld [vmem:[#allocation5 + $0x8b0] sm:$0xff]   ;;  %v7092_v53 = vld [vmem:[#allocation5 + $0x838] sm:$0xff]   ;;  %v152_v60 = vpack.c.bf16 %v88_v57, %v88_v57  ;;  %v7132_v57 = vld [vmem:[#allocation5 + $0xa08] sm:$0xff]  }
 0x131   :  { %v7474_v52 = vadd.f32 %v6136_v47, %v6114_v44  ;;  %v7083_v44 = vld [vmem:[#allocation5 + $0x8e8] sm:$0xff]   ;;  %v7086_v47 = vld [vmem:[#allocation5 + $0x870] sm:$0xff]  }
 0x132   :  { %6417 = vmatpush3.bf16.msra.mxu0 %v7056_v61  ;;  %v86_v55 = vld [vmem:[#allocation2 + $0x108] sm:$0xff]  ;;  %v87_v59 = vld [vmem:[#allocation2 + $0x110] sm:$0xff]  ;;  %v149_v61 = vpack.c.bf16 %v85_v58, %v85_v58 }
 0x133   :  { %6439 = vmatpush3.bf16.msra.mxu1 %v7057_v62  ;;  %6418 = vmatprep.subr.bf16.mxu0 %v7058_v63  ;;  %v150_v56 = vpack.c.bf16 %v86_v55, %v86_v55  ;;  %v151_v62 = vpack.c.bf16 %v87_v59, %v87_v59  ;;  %v7094_v63 = vld [vmem:[#allocation5 + $0x940] sm:$0xff]   ;;  %v7130_v55 = vld [vmem:[#allocation5 + $0xa48] sm:$0xff]   ;;  %v7134_v59 = vld [vmem:[#allocation5 + $0xa50] sm:$0xff]  }
 0x134   :  { %6440 = vmatprep.subr.bf16.mxu1 %v7059_v0  ;;  %v7095_v0 = vld [vmem:[#allocation5 + $0x9c0] sm:$0xff]   ;;  %v7133_v58 = vld [vmem:[#allocation5 + $0xa88] sm:$0xff]  }
 0x136   :  { %6419 = vmatpush3.bf16.msra.mxu0 %v7060_v1  ;;  %v7096_v1 = vld [vmem:[#allocation5 + $0x900] sm:$0xff]  }
 0x137   :  { %6441 = vmatpush3.bf16.msra.mxu1 %v7061_v2  ;;  %6448 = vmatprep.subr.bf16.mxu0 %v7062_v11  ;;  %v7097_v2 = vld [vmem:[#allocation5 + $0x980] sm:$0xff]   ;;  %v7106_v11 = vld [vmem:[#allocation5 + $0x958] sm:$0xff]  }
 0x138   :  { %6470 = vmatprep.subr.bf16.mxu1 %v7063_v12  ;;  %v7107_v12 = vld [vmem:[#allocation5 + $0x9d8] sm:$0xff]  }
 0x139   :  { %4870 = vmatmul.mubr.bf16.vlgmr.msra.gmra.mrb[28].mxu0 %v145_v9  ;;  %v7104_v9 = vld [vmem:[#allocation5 + $0x910] sm:$0xff]  }
 0x13a   :  { %4910 = vmatmul.mubr.bf16.vlgmr.msra.gmra.mrb[28].mxu1 %v147_v10  ;;  %6449 = vmatpush3.bf16.msra.mxu0 %v7064_v13  ;;  %v7105_v10 = vld [vmem:[#allocation5 + $0x990] sm:$0xff]  }
 0x13b   :  { %6471 = vmatpush3.bf16.msra.mxu1 %v7065_v14  ;;  %6450 = vmatprep.subr.bf16.mxu0 %v7066_v15  ;;  %v7108_v14 = vld [vmem:[#allocation5 + $0x918] sm:$0xff]  }
 0x13c   :  { %6472 = vmatprep.subr.bf16.mxu1 %v7067_v16  ;;  %4949 = vmatprep.mubr.bf16.mxu0 %v150_v56  ;;  %v7109_v16 = vld [vmem:[#allocation5 + $0x998] sm:$0xff]   ;;  %v7131_v56 = vld [vmem:[#allocation5 + $0xac8] sm:$0xff]  }
 0x13d   :  { %4989 = vmatprep.mubr.bf16.mxu1 %v152_v60  ;;  %v7135_v60 = vld [vmem:[#allocation5 + $0xad0] sm:$0xff]  }
 0x13e   :  { %6451 = vmatpush3.bf16.msra.mxu0 %v7068_v17 }
 0x13f   :  { %6473 = vmatpush3.bf16.msra.mxu1 %v7069_v18  ;;  %6452 = vmatprep.subr.bf16.mxu0 %v7070_v19  ;;  %v7110_v18 = vld [vmem:[#allocation5 + $0x960] sm:$0xff]  }
 0x140   :  { %6474 = vmatprep.subr.bf16.mxu1 %v7071_v20 }
 0x142   :  { %6453 = vmatpush3.bf16.msra.mxu0 %v7072_v21  ;;  %v7111_v21 = vld [vmem:[#allocation5 + $0x9e0] sm:$0xff]  }
 0x143   :  { %6475 = vmatpush3.bf16.msra.mxu1 %v7073_v22  ;;  %6454 = vmatprep.subr.bf16.mxu0 %v7074_v23 }
 0x144   :  { %6476 = vmatprep.subr.bf16.mxu1 %v7075_v24  ;;  %v7112_v24 = vld [vmem:[#allocation5 + $0x920] sm:$0xff]  }
 0x146   :  { %6455 = vmatpush3.bf16.msra.mxu0 %v7076_v26 }
 0x147   :  { %6477 = vmatpush3.bf16.msra.mxu1 %v7077_v28  ;;  %6456 = vmatprep.subr.bf16.mxu0 %v7078_v30  ;;  %v7114_v30 = vld [vmem:[#allocation5 + $0x968] sm:$0xff]  }
 0x148   :  { %6478 = vmatprep.subr.bf16.mxu1 %v7079_v33  ;;  %v7116_v33 = vld [vmem:[#allocation5 + $0x928] sm:$0xff]  }
 0x14a   :  { %6457 = vmatpush3.bf16.msra.mxu0 %v7080_v36  ;;  %v7119_v36 = vld [vmem:[#allocation5 + $0x9f0] sm:$0xff]  }
 0x14b   :  { %6479 = vmatpush3.bf16.msra.mxu1 %v7081_v39  ;;  %6458 = vmatprep.subr.bf16.mxu0 %v7082_v42  ;;  %v7122_v39 = vld [vmem:[#allocation5 + $0x978] sm:$0xff]  }
 0x14c   :  { %v6156_v25 = vpop.f32.mrb[4].mxu0  ;;  %6480 = vmatprep.subr.bf16.mxu1 %v7083_v44  ;;  %v7125_v42 = vld [vmem:[#allocation5 + $0x9b8] sm:$0xff]  }
 0x14d   :  { %v6178_v27 = vpop.f32.mrb[4].mxu1  ;;  %v6157_v29 = vpop.f32.mrb[5].mxu0  ;;  %v92_v44 = vld [vmem:[#allocation2 + $0x138] sm:$0xff] }
 0x14e   :  { %v6158_v31 = vadd.f32 %v6157_v29, %v6156_v25  ;;  %v6179_v32 = vpop.f32.mrb[5].mxu1  ;;  %v6159_v35 = vpop.f32.mrb[6].mxu0  ;;  %6459 = vmatpush3.bf16.msra.mxu0 %v7084_v45  ;;  %v89_v45 = vld [vmem:[#allocation2 + $0x120] sm:$0xff] }
 0x14f   :  { %v6180_v34 = vadd.f32 %v6179_v32, %v6178_v27  ;;  %v6181_v38 = vpop.f32.mrb[6].mxu1  ;;  %v6160_v40 = vpop.f32.mrb[7].mxu0  ;;  %6481 = vmatpush3.bf16.msra.mxu1 %v7085_v46  ;;  %6460 = vmatprep.subr.bf16.mxu0 %v7086_v47  ;;  %v7113_v27 = vld [vmem:[#allocation5 + $0x9a0] sm:$0xff]   ;;  %v7115_v32 = vld [vmem:[#allocation5 + $0x9e8] sm:$0xff]   ;;  %v7118_v35 = vld [vmem:[#allocation5 + $0x970] sm:$0xff]   ;;  %v156_v47 = vpack.c.bf16 %v92_v44, %v92_v44 }
 0x150   :  { %v4392_v37 = vadd.f32 %v6158_v31, %v7474_v52  ;;  %v6182_v43 = vpop.f32.mrb[7].mxu1  ;;  %6482 = vmatprep.subr.bf16.mxu1 %v7087_v48  ;;  %v7091_v52 = vld [vmem:[#allocation5 + $0x8f8] sm:$0xff]   ;;  %v7121_v38 = vld [vmem:[#allocation5 + $0x9b0] sm:$0xff]   ;;  %v153_v48 = vpack.c.bf16 %v89_v45, %v89_v45  ;;  %v7163_v44 = vld [vmem:[#allocation5 + $0xbc8] sm:$0xff]  }
 0x151   :  { %v7123_v40 = vld [vmem:[#allocation5 + $0x9f8] sm:$0xff]   ;;  %v90_v43 = vld [vmem:[#allocation2 + $0x128] sm:$0xff] }
 0x152   :  { %v7477_v41 = vadd.f32 %v6180_v34, %v4392_v37  ;;  %6461 = vmatpush3.bf16.msra.mxu0 %v7088_v49  ;;  %v7117_v34 = vld [vmem:[#allocation5 + $0x9a8] sm:$0xff]   ;;  %v7120_v37 = vld [vmem:[#allocation5 + $0x930] sm:$0xff]   ;;  %v154_v46 = vpack.c.bf16 %v90_v43, %v90_v43 }
 0x153   :  { %6483 = vmatpush3.bf16.msra.mxu1 %v7089_v50  ;;  %6462 = vmatprep.subr.bf16.mxu0 %v7090_v51  ;;  %v91_v49 = vld [vmem:[#allocation2 + $0x130] sm:$0xff]  ;;  %v7126_v51 = vld [vmem:[#allocation5 + $0xa40] sm:$0xff]   ;;  %v7162_v43 = vld [vmem:[#allocation5 + $0xb48] sm:$0xff]  }
 0x154   :  { %6484 = vmatprep.subr.bf16.mxu1 %v7091_v52  ;;  %v155_v50 = vpack.c.bf16 %v91_v49, %v91_v49  ;;  %v7127_v52 = vld [vmem:[#allocation5 + $0xac0] sm:$0xff]   ;;  %v7164_v45 = vld [vmem:[#allocation5 + $0xb08] sm:$0xff]   ;;  %v7168_v49 = vld [vmem:[#allocation5 + $0xb10] sm:$0xff]  }
 0x156   :  { %6463 = vmatpush3.bf16.msra.mxu0 %v7092_v53  ;;  %v7128_v53 = vld [vmem:[#allocation5 + $0xa00] sm:$0xff]  }
 0x157   :  { %6485 = vmatpush3.bf16.msra.mxu1 %v7093_v54  ;;  %6492 = vmatprep.subr.bf16.mxu0 %v7094_v63  ;;  %v7129_v54 = vld [vmem:[#allocation5 + $0xa80] sm:$0xff]   ;;  %v7138_v63 = vld [vmem:[#allocation5 + $0xa58] sm:$0xff]  }
 0x158   :  { %6514 = vmatprep.subr.bf16.mxu1 %v7095_v0  ;;  %v7139_v0 = vld [vmem:[#allocation5 + $0xad8] sm:$0xff]  }
 0x159   :  { %4950 = vmatmul.mubr.bf16.vlgmr.msra.gmra.mrb[32].mxu0 %v149_v61  ;;  %v7136_v61 = vld [vmem:[#allocation5 + $0xa10] sm:$0xff]  }
 0x15a   :  { %4990 = vmatmul.mubr.bf16.vlgmr.msra.gmra.mrb[32].mxu1 %v151_v62  ;;  %6493 = vmatpush3.bf16.msra.mxu0 %v7096_v1  ;;  %v7137_v62 = vld [vmem:[#allocation5 + $0xa90] sm:$0xff]  }
 0x15b   :  { %6515 = vmatpush3.bf16.msra.mxu1 %v7097_v2  ;;  %6494 = vmatprep.subr.bf16.mxu0 %v7098_v3  ;;  %v7140_v2 = vld [vmem:[#allocation5 + $0xa18] sm:$0xff]  }
 0x15c   :  { %6516 = vmatprep.subr.bf16.mxu1 %v7099_v4  ;;  %5029 = vmatprep.mubr.bf16.mxu0 %v154_v46  ;;  %v7141_v4 = vld [vmem:[#allocation5 + $0xa98] sm:$0xff]   ;;  %v7165_v46 = vld [vmem:[#allocation5 + $0xb88] sm:$0xff]  }
 0x15d   :  { %5069 = vmatprep.mubr.bf16.mxu1 %v156_v47  ;;  %v7166_v47 = vld [vmem:[#allocation5 + $0xb50] sm:$0xff]  }
 0x15e   :  { %6495 = vmatpush3.bf16.msra.mxu0 %v7100_v5 }
 0x15f   :  { %6517 = vmatpush3.bf16.msra.mxu1 %v7101_v6  ;;  %6496 = vmatprep.subr.bf16.mxu0 %v7102_v7  ;;  %v7142_v6 = vld [vmem:[#allocation5 + $0xa60] sm:$0xff]  }
 0x160   :  { %6518 = vmatprep.subr.bf16.mxu1 %v7103_v8 }
 0x162   :  { %6497 = vmatpush3.bf16.msra.mxu0 %v7104_v9  ;;  %v7143_v9 = vld [vmem:[#allocation5 + $0xae0] sm:$0xff]  }
 0x163   :  { %6519 = vmatpush3.bf16.msra.mxu1 %v7105_v10  ;;  %6498 = vmatprep.subr.bf16.mxu0 %v7106_v11 }
 0x164   :  { %6520 = vmatprep.subr.bf16.mxu1 %v7107_v12  ;;  %v7144_v12 = vld [vmem:[#allocation5 + $0xa20] sm:$0xff]  }
 0x166   :  { %6499 = vmatpush3.bf16.msra.mxu0 %v7108_v14 }
 0x167   :  { %6521 = vmatpush3.bf16.msra.mxu1 %v7109_v16  ;;  %6500 = vmatprep.subr.bf16.mxu0 %v7110_v18  ;;  %v7146_v18 = vld [vmem:[#allocation5 + $0xa68] sm:$0xff]  }
 0x168   :  { %6522 = vmatprep.subr.bf16.mxu1 %v7111_v21  ;;  %v7148_v21 = vld [vmem:[#allocation5 + $0xa28] sm:$0xff]  }
 0x16a   :  { %6501 = vmatpush3.bf16.msra.mxu0 %v7112_v24  ;;  %v7151_v24 = vld [vmem:[#allocation5 + $0xaf0] sm:$0xff]  }
 0x16b   :  { %6523 = vmatpush3.bf16.msra.mxu1 %v7113_v27  ;;  %6502 = vmatprep.subr.bf16.mxu0 %v7114_v30  ;;  %v7154_v27 = vld [vmem:[#allocation5 + $0xa78] sm:$0xff]  }
 0x16c   :  { %v6200_v13 = vpop.f32.mrb[8].mxu0  ;;  %6524 = vmatprep.subr.bf16.mxu1 %v7115_v32  ;;  %v7157_v30 = vld [vmem:[#allocation5 + $0xab8] sm:$0xff]  }
 0x16d   :  { %v6222_v15 = vpop.f32.mrb[8].mxu1  ;;  %v6201_v17 = vpop.f32.mrb[9].mxu0  ;;  %v96_v32 = vld [vmem:[#allocation2 + $0x158] sm:$0xff] }
 0x16e   :  { %v6202_v19 = vadd.f32 %v6201_v17, %v6200_v13  ;;  %v6223_v20 = vpop.f32.mrb[9].mxu1  ;;  %v6203_v23 = vpop.f32.mrb[10].mxu0  ;;  %6503 = vmatpush3.bf16.msra.mxu0 %v7116_v33 }
 0x16f   :  { %v6224_v22 = vadd.f32 %v6223_v20, %v6222_v15  ;;  %v6225_v26 = vpop.f32.mrb[10].mxu1  ;;  %v6204_v28 = vpop.f32.mrb[11].mxu0  ;;  %6525 = vmatpush3.bf16.msra.mxu1 %v7117_v34  ;;  %6504 = vmatprep.subr.bf16.mxu0 %v7118_v35  ;;  %v7145_v15 = vld [vmem:[#allocation5 + $0xaa0] sm:$0xff]   ;;  %v7147_v20 = vld [vmem:[#allocation5 + $0xae8] sm:$0xff]   ;;  %v7150_v23 = vld [vmem:[#allocation5 + $0xa70] sm:$0xff]   ;;  %v160_v34 = vpack.c.bf16 %v96_v32, %v96_v32 }
 0x170   :  { %v4472_v25 = vadd.f32 %v6202_v19, %v7477_v41  ;;  %v6226_v31 = vpop.f32.mrb[11].mxu1  ;;  %6526 = vmatprep.subr.bf16.mxu1 %v7119_v36  ;;  %v7124_v41 = vld [vmem:[#allocation5 + $0x938] sm:$0xff]   ;;  %v7153_v26 = vld [vmem:[#allocation5 + $0xab0] sm:$0xff]   ;;  %v93_v35 = vld [vmem:[#allocation2 + $0x140] sm:$0xff] }
 0x171   :  { %v7155_v28 = vld [vmem:[#allocation5 + $0xaf8] sm:$0xff]   ;;  %v94_v31 = vld [vmem:[#allocation2 + $0x148] sm:$0xff]  ;;  %v95_v36 = vld [vmem:[#allocation2 + $0x150] sm:$0xff] }
 0x172   :  { %v7480_v29 = vadd.f32 %v6224_v22, %v4472_v25  ;;  %6505 = vmatpush3.bf16.msra.mxu0 %v7120_v37  ;;  %v7149_v22 = vld [vmem:[#allocation5 + $0xaa8] sm:$0xff]   ;;  %v7152_v25 = vld [vmem:[#allocation5 + $0xa30] sm:$0xff]   ;;  %v158_v33 = vpack.c.bf16 %v94_v31, %v94_v31  ;;  %v157_v37 = vpack.c.bf16 %v93_v35, %v93_v35 }
 0x173   :  { %6527 = vmatpush3.bf16.msra.mxu1 %v7121_v38  ;;  %6506 = vmatprep.subr.bf16.mxu0 %v7122_v39  ;;  %v159_v38 = vpack.c.bf16 %v95_v36, %v95_v36  ;;  %v7158_v39 = vld [vmem:[#allocation5 + $0xb40] sm:$0xff]   ;;  %v7194_v31 = vld [vmem:[#allocation5 + $0xc48] sm:$0xff]   ;;  %v7198_v35 = vld [vmem:[#allocation5 + $0xc50] sm:$0xff]  }
 0x174   :  { %6528 = vmatprep.subr.bf16.mxu1 %v7123_v40  ;;  %v7159_v40 = vld [vmem:[#allocation5 + $0xbc0] sm:$0xff]   ;;  %v7195_v32 = vld [vmem:[#allocation5 + $0xcc8] sm:$0xff]   ;;  %v7199_v36 = vld [vmem:[#allocation5 + $0xcd0] sm:$0xff]  }
 0x176   :  { %6507 = vmatpush3.bf16.msra.mxu0 %v7124_v41  ;;  %v7160_v41 = vld [vmem:[#allocation5 + $0xb00] sm:$0xff]  }
 0x177   :  { %6529 = vmatpush3.bf16.msra.mxu1 %v7125_v42  ;;  %6536 = vmatprep.subr.bf16.mxu0 %v7126_v51  ;;  %v7161_v42 = vld [vmem:[#allocation5 + $0xb80] sm:$0xff]   ;;  %v7170_v51 = vld [vmem:[#allocation5 + $0xb58] sm:$0xff]  }
 0x178   :  { %6558 = vmatprep.subr.bf16.mxu1 %v7127_v52  ;;  %v7171_v52 = vld [vmem:[#allocation5 + $0xbd8] sm:$0xff]  }
 0x179   :  { %5030 = vmatmul.mubr.bf16.vlgmr.msra.gmra.mrb[36].mxu0 %v153_v48  ;;  %v7167_v48 = vld [vmem:[#allocation5 + $0xbd0] sm:$0xff]  }
 0x17a   :  { %5070 = vmatmul.mubr.bf16.vlgmr.msra.gmra.mrb[36].mxu1 %v155_v50  ;;  %6537 = vmatpush3.bf16.msra.mxu0 %v7128_v53  ;;  %v7169_v50 = vld [vmem:[#allocation5 + $0xb90] sm:$0xff]  }
 0x17b   :  { %6559 = vmatpush3.bf16.msra.mxu1 %v7129_v54  ;;  %6538 = vmatprep.subr.bf16.mxu0 %v7130_v55  ;;  %v7172_v54 = vld [vmem:[#allocation5 + $0xb18] sm:$0xff]  }
 0x17c   :  { %6560 = vmatprep.subr.bf16.mxu1 %v7131_v56  ;;  %5109 = vmatprep.mubr.bf16.mxu0 %v158_v33  ;;  %v7173_v56 = vld [vmem:[#allocation5 + $0xb98] sm:$0xff]   ;;  %v7196_v33 = vld [vmem:[#allocation5 + $0xc08] sm:$0xff]  }
 0x17d   :  { %5149 = vmatprep.mubr.bf16.mxu1 %v160_v34  ;;  %v7197_v34 = vld [vmem:[#allocation5 + $0xc88] sm:$0xff]  }
 0x17e   :  { %6539 = vmatpush3.bf16.msra.mxu0 %v7132_v57 }
 0x17f   :  { %6561 = vmatpush3.bf16.msra.mxu1 %v7133_v58  ;;  %6540 = vmatprep.subr.bf16.mxu0 %v7134_v59  ;;  %v7174_v58 = vld [vmem:[#allocation5 + $0xb60] sm:$0xff]  }
 0x180   :  { %6562 = vmatprep.subr.bf16.mxu1 %v7135_v60 }
 0x182   :  { %6541 = vmatpush3.bf16.msra.mxu0 %v7136_v61  ;;  %v7175_v61 = vld [vmem:[#allocation5 + $0xbe0] sm:$0xff]  }
 0x183   :  { %6563 = vmatpush3.bf16.msra.mxu1 %v7137_v62  ;;  %6542 = vmatprep.subr.bf16.mxu0 %v7138_v63 }
 0x184   :  { %6564 = vmatprep.subr.bf16.mxu1 %v7139_v0  ;;  %v7176_v0 = vld [vmem:[#allocation5 + $0xb20] sm:$0xff]  }
 0x186   :  { %6543 = vmatpush3.bf16.msra.mxu0 %v7140_v2 }
 0x187   :  { %6565 = vmatpush3.bf16.msra.mxu1 %v7141_v4  ;;  %6544 = vmatprep.subr.bf16.mxu0 %v7142_v6  ;;  %v7178_v6 = vld [vmem:[#allocation5 + $0xb68] sm:$0xff]  }
 0x188   :  { %6566 = vmatprep.subr.bf16.mxu1 %v7143_v9  ;;  %v7180_v9 = vld [vmem:[#allocation5 + $0xb28] sm:$0xff]  }
 0x18a   :  { %6545 = vmatpush3.bf16.msra.mxu0 %v7144_v12  ;;  %v7183_v12 = vld [vmem:[#allocation5 + $0xbf0] sm:$0xff]  }
 0x18b   :  { %6567 = vmatpush3.bf16.msra.mxu1 %v7145_v15  ;;  %6546 = vmatprep.subr.bf16.mxu0 %v7146_v18  ;;  %v7186_v15 = vld [vmem:[#allocation5 + $0xb78] sm:$0xff]  }
 0x18c   :  { %v6244_v1 = vpop.f32.mrb[12].mxu0  ;;  %6568 = vmatprep.subr.bf16.mxu1 %v7147_v20  ;;  %v7189_v18 = vld [vmem:[#allocation5 + $0xbb8] sm:$0xff]  }
 0x18d   :  { %v6266_v3 = vpop.f32.mrb[12].mxu1  ;;  %v6245_v5 = vpop.f32.mrb[13].mxu0 }
 0x18e   :  { %v6246_v7 = vadd.f32 %v6245_v5, %v6244_v1  ;;  %v6267_v8 = vpop.f32.mrb[13].mxu1  ;;  %v6247_v11 = vpop.f32.mrb[14].mxu0  ;;  %6547 = vmatpush3.bf16.msra.mxu0 %v7148_v21  ;;  %v100_v21 = vld [vmem:[#allocation2 + $0x178] sm:$0xff] }
 0x18f   :  { %v6268_v10 = vadd.f32 %v6267_v8, %v6266_v3  ;;  %v6269_v14 = vpop.f32.mrb[14].mxu1  ;;  %v6248_v16 = vpop.f32.mrb[15].mxu0  ;;  %6569 = vmatpush3.bf16.msra.mxu1 %v7149_v22  ;;  %6548 = vmatprep.subr.bf16.mxu0 %v7150_v23  ;;  %v7177_v3 = vld [vmem:[#allocation5 + $0xba0] sm:$0xff]   ;;  %v7179_v8 = vld [vmem:[#allocation5 + $0xbe8] sm:$0xff]   ;;  %v7182_v11 = vld [vmem:[#allocation5 + $0xb70] sm:$0xff]  }
 0x190   :  { %v4552_v13 = vadd.f32 %v6246_v7, %v7480_v29  ;;  %v6270_v19 = vpop.f32.mrb[15].mxu1  ;;  %6570 = vmatprep.subr.bf16.mxu1 %v7151_v24  ;;  %v7156_v29 = vld [vmem:[#allocation5 + $0xa38] sm:$0xff]   ;;  %v7185_v14 = vld [vmem:[#allocation5 + $0xbb0] sm:$0xff]   ;;  %v97_v22 = vld [vmem:[#allocation2 + $0x160] sm:$0xff]  ;;  %v164_v24 = vpack.c.bf16 %v100_v21, %v100_v21 }
 0x191   :  { %v7187_v16 = vld [vmem:[#allocation5 + $0xbf8] sm:$0xff]   ;;  %v98_v19 = vld [vmem:[#allocation2 + $0x168] sm:$0xff]  ;;  %v99_v23 = vld [vmem:[#allocation2 + $0x170] sm:$0xff] }
 0x192   :  { %v7483_v17 = vadd.f32 %v6268_v10, %v4552_v13  ;;  %6549 = vmatpush3.bf16.msra.mxu0 %v7152_v25  ;;  %v7181_v10 = vld [vmem:[#allocation5 + $0xba8] sm:$0xff]   ;;  %v7184_v13 = vld [vmem:[#allocation5 + $0xb30] sm:$0xff]   ;;  %v162_v20 = vpack.c.bf16 %v98_v19, %v98_v19  ;;  %v161_v25 = vpack.c.bf16 %v97_v22, %v97_v22 }
 0x193   :  { %6571 = vmatpush3.bf16.msra.mxu1 %v7153_v26  ;;  %6550 = vmatprep.subr.bf16.mxu0 %v7154_v27  ;;  %v163_v26 = vpack.c.bf16 %v99_v23, %v99_v23  ;;  %v7190_v27 = vld [vmem:[#allocation5 + $0xc40] sm:$0xff]   ;;  %v7226_v19 = vld [vmem:[#allocation5 + $0xd48] sm:$0xff]   ;;  %v7230_v23 = vld [vmem:[#allocation5 + $0xd50] sm:$0xff]  }
 0x194   :  { %6572 = vmatprep.subr.bf16.mxu1 %v7155_v28  ;;  %v7191_v28 = vld [vmem:[#allocation5 + $0xcc0] sm:$0xff]   ;;  %v7228_v21 = vld [vmem:[#allocation5 + $0xd08] sm:$0xff]  }
 0x195   :  { %v7229_v22 = vld [vmem:[#allocation5 + $0xd88] sm:$0xff]  }
 0x196   :  { %6551 = vmatpush3.bf16.msra.mxu0 %v7156_v29  ;;  %v7192_v29 = vld [vmem:[#allocation5 + $0xc00] sm:$0xff]  }
 0x197   :  { %6573 = vmatpush3.bf16.msra.mxu1 %v7157_v30  ;;  %6580 = vmatprep.subr.bf16.mxu0 %v7158_v39  ;;  %v7193_v30 = vld [vmem:[#allocation5 + $0xc80] sm:$0xff]   ;;  %v7202_v39 = vld [vmem:[#allocation5 + $0xc58] sm:$0xff]  }
 0x198   :  { %6602 = vmatprep.subr.bf16.mxu1 %v7159_v40  ;;  %v7203_v40 = vld [vmem:[#allocation5 + $0xcd8] sm:$0xff]  }
 0x199   :  { %5110 = vmatmul.mubr.bf16.vlgmr.msra.gmra.mrb[40].mxu0 %v157_v37  ;;  %v7200_v37 = vld [vmem:[#allocation5 + $0xc10] sm:$0xff]  }
 0x19a   :  { %5150 = vmatmul.mubr.bf16.vlgmr.msra.gmra.mrb[40].mxu1 %v159_v38  ;;  %6581 = vmatpush3.bf16.msra.mxu0 %v7160_v41  ;;  %v7201_v38 = vld [vmem:[#allocation5 + $0xc90] sm:$0xff]  }
 0x19b   :  { %6603 = vmatpush3.bf16.msra.mxu1 %v7161_v42  ;;  %6582 = vmatprep.subr.bf16.mxu0 %v7162_v43  ;;  %v7204_v42 = vld [vmem:[#allocation5 + $0xc18] sm:$0xff]  }
 0x19c   :  { %6604 = vmatprep.subr.bf16.mxu1 %v7163_v44  ;;  %5189 = vmatprep.mubr.bf16.mxu0 %v162_v20  ;;  %v7205_v44 = vld [vmem:[#allocation5 + $0xc98] sm:$0xff]   ;;  %v7227_v20 = vld [vmem:[#allocation5 + $0xdc8] sm:$0xff]  }
 0x19d   :  { %5229 = vmatprep.mubr.bf16.mxu1 %v164_v24  ;;  %v7231_v24 = vld [vmem:[#allocation5 + $0xdd0] sm:$0xff]  }
 0x19e   :  { %6583 = vmatpush3.bf16.msra.mxu0 %v7164_v45 }
 0x19f   :  { %6605 = vmatpush3.bf16.msra.mxu1 %v7165_v46  ;;  %6584 = vmatprep.subr.bf16.mxu0 %v7166_v47  ;;  %v7206_v46 = vld [vmem:[#allocation5 + $0xc60] sm:$0xff]  }
 0x1a0   :  { %6606 = vmatprep.subr.bf16.mxu1 %v7167_v48 }
 0x1a2   :  { %6585 = vmatpush3.bf16.msra.mxu0 %v7168_v49  ;;  %v7207_v49 = vld [vmem:[#allocation5 + $0xce0] sm:$0xff]  }
 0x1a3   :  { %6607 = vmatpush3.bf16.msra.mxu1 %v7169_v50  ;;  %6586 = vmatprep.subr.bf16.mxu0 %v7170_v51 }
 0x1a4   :  { %6608 = vmatprep.subr.bf16.mxu1 %v7171_v52  ;;  %v7208_v52 = vld [vmem:[#allocation5 + $0xc20] sm:$0xff]  }
 0x1a6   :  { %6587 = vmatpush3.bf16.msra.mxu0 %v7172_v54 }
 0x1a7   :  { %6609 = vmatpush3.bf16.msra.mxu1 %v7173_v56  ;;  %6588 = vmatprep.subr.bf16.mxu0 %v7174_v58  ;;  %v7210_v58 = vld [vmem:[#allocation5 + $0xc68] sm:$0xff]  }
 0x1a8   :  { %6610 = vmatprep.subr.bf16.mxu1 %v7175_v61  ;;  %v7212_v61 = vld [vmem:[#allocation5 + $0xc28] sm:$0xff]  }
 0x1aa   :  { %6589 = vmatpush3.bf16.msra.mxu0 %v7176_v0  ;;  %v7215_v0 = vld [vmem:[#allocation5 + $0xcf0] sm:$0xff]  }
 0x1ab   :  { %6611 = vmatpush3.bf16.msra.mxu1 %v7177_v3  ;;  %6590 = vmatprep.subr.bf16.mxu0 %v7178_v6  ;;  %v7218_v3 = vld [vmem:[#allocation5 + $0xc78] sm:$0xff]  }
 0x1ac   :  { %v6288_v53 = vpop.f32.mrb[16].mxu0  ;;  %6612 = vmatprep.subr.bf16.mxu1 %v7179_v8  ;;  %v7221_v6 = vld [vmem:[#allocation5 + $0xcb8] sm:$0xff]  }
 0x1ad   :  { %v6310_v55 = vpop.f32.mrb[16].mxu1  ;;  %v6289_v57 = vpop.f32.mrb[17].mxu0  ;;  %v104_v8 = vld [vmem:[#allocation2 + $0x198] sm:$0xff] }
 0x1ae   :  { %v6290_v59 = vadd.f32 %v6289_v57, %v6288_v53  ;;  %v6311_v60 = vpop.f32.mrb[17].mxu1  ;;  %v6291_v63 = vpop.f32.mrb[18].mxu0  ;;  %6591 = vmatpush3.bf16.msra.mxu0 %v7180_v9  ;;  %v101_v9 = vld [vmem:[#allocation2 + $0x180] sm:$0xff] }
 0x1af   :  { %v6312_v62 = vadd.f32 %v6311_v60, %v6310_v55  ;;  %v6313_v2 = vpop.f32.mrb[18].mxu1  ;;  %v6292_v4 = vpop.f32.mrb[19].mxu0  ;;  %6613 = vmatpush3.bf16.msra.mxu1 %v7181_v10  ;;  %6592 = vmatprep.subr.bf16.mxu0 %v7182_v11  ;;  %v7209_v55 = vld [vmem:[#allocation5 + $0xca0] sm:$0xff]   ;;  %v7211_v60 = vld [vmem:[#allocation5 + $0xce8] sm:$0xff]   ;;  %v7214_v63 = vld [vmem:[#allocation5 + $0xc70] sm:$0xff]   ;;  %v168_v11 = vpack.c.bf16 %v104_v8, %v104_v8 }
 0x1b0   :  { %v4632_v1 = vadd.f32 %v6290_v59, %v7483_v17  ;;  %v6314_v7 = vpop.f32.mrb[19].mxu1  ;;  %6614 = vmatprep.subr.bf16.mxu1 %v7183_v12  ;;  %v7188_v17 = vld [vmem:[#allocation5 + $0xb38] sm:$0xff]   ;;  %v7217_v2 = vld [vmem:[#allocation5 + $0xcb0] sm:$0xff]   ;;  %v165_v12 = vpack.c.bf16 %v101_v9, %v101_v9  ;;  %v7259_v8 = vld [vmem:[#allocation5 + $0xec8] sm:$0xff]  }
 0x1b1   :  { %v7219_v4 = vld [vmem:[#allocation5 + $0xcf8] sm:$0xff]   ;;  %v102_v7 = vld [vmem:[#allocation2 + $0x188] sm:$0xff] }
 0x1b2   :  { %v7486_v5 = vadd.f32 %v6312_v62, %v4632_v1  ;;  %6593 = vmatpush3.bf16.msra.mxu0 %v7184_v13  ;;  %v7213_v62 = vld [vmem:[#allocation5 + $0xca8] sm:$0xff]   ;;  %v7216_v1 = vld [vmem:[#allocation5 + $0xc30] sm:$0xff]   ;;  %v166_v10 = vpack.c.bf16 %v102_v7, %v102_v7 }
 0x1b3   :  { %6615 = vmatpush3.bf16.msra.mxu1 %v7185_v14  ;;  %6594 = vmatprep.subr.bf16.mxu0 %v7186_v15  ;;  %v103_v13 = vld [vmem:[#allocation2 + $0x190] sm:$0xff]  ;;  %v7222_v15 = vld [vmem:[#allocation5 + $0xd40] sm:$0xff]   ;;  %v7258_v7 = vld [vmem:[#allocation5 + $0xe48] sm:$0xff]  }
 0x1b4   :  { %6616 = vmatprep.subr.bf16.mxu1 %v7187_v16  ;;  %v167_v14 = vpack.c.bf16 %v103_v13, %v103_v13  ;;  %v7223_v16 = vld [vmem:[#allocation5 + $0xdc0] sm:$0xff]   ;;  %v7260_v9 = vld [vmem:[#allocation5 + $0xe08] sm:$0xff]   ;;  %v7264_v13 = vld [vmem:[#allocation5 + $0xe10] sm:$0xff]  }
 0x1b6   :  { %6595 = vmatpush3.bf16.msra.mxu0 %v7188_v17  ;;  %v7224_v17 = vld [vmem:[#allocation5 + $0xd00] sm:$0xff]  }
 0x1b7   :  { %6617 = vmatpush3.bf16.msra.mxu1 %v7189_v18  ;;  %6624 = vmatprep.subr.bf16.mxu0 %v7190_v27  ;;  %v7225_v18 = vld [vmem:[#allocation5 + $0xd80] sm:$0xff]   ;;  %v7234_v27 = vld [vmem:[#allocation5 + $0xd58] sm:$0xff]  }
 0x1b8   :  { %6646 = vmatprep.subr.bf16.mxu1 %v7191_v28  ;;  %v7235_v28 = vld [vmem:[#allocation5 + $0xdd8] sm:$0xff]  }
 0x1b9   :  { %5190 = vmatmul.mubr.bf16.vlgmr.msra.gmra.mrb[44].mxu0 %v161_v25  ;;  %v7232_v25 = vld [vmem:[#allocation5 + $0xd10] sm:$0xff]  }
 0x1ba   :  { %5230 = vmatmul.mubr.bf16.vlgmr.msra.gmra.mrb[44].mxu1 %v163_v26  ;;  %6625 = vmatpush3.bf16.msra.mxu0 %v7192_v29  ;;  %v7233_v26 = vld [vmem:[#allocation5 + $0xd90] sm:$0xff]  }
 0x1bb   :  { %6647 = vmatpush3.bf16.msra.mxu1 %v7193_v30  ;;  %6626 = vmatprep.subr.bf16.mxu0 %v7194_v31  ;;  %v7236_v30 = vld [vmem:[#allocation5 + $0xd18] sm:$0xff]  }
 0x1bc   :  { %6648 = vmatprep.subr.bf16.mxu1 %v7195_v32  ;;  %5269 = vmatprep.mubr.bf16.mxu0 %v166_v10  ;;  %v7237_v32 = vld [vmem:[#allocation5 + $0xd98] sm:$0xff]   ;;  %v7261_v10 = vld [vmem:[#allocation5 + $0xe88] sm:$0xff]  }
 0x1bd   :  { %5309 = vmatprep.mubr.bf16.mxu1 %v168_v11  ;;  %v7262_v11 = vld [vmem:[#allocation5 + $0xe50] sm:$0xff]  }
 0x1be   :  { %6627 = vmatpush3.bf16.msra.mxu0 %v7196_v33 }
 0x1bf   :  { %6649 = vmatpush3.bf16.msra.mxu1 %v7197_v34  ;;  %6628 = vmatprep.subr.bf16.mxu0 %v7198_v35  ;;  %v7238_v34 = vld [vmem:[#allocation5 + $0xd60] sm:$0xff]  }
 0x1c0   :  { %6650 = vmatprep.subr.bf16.mxu1 %v7199_v36 }
 0x1c2   :  { %6629 = vmatpush3.bf16.msra.mxu0 %v7200_v37  ;;  %v7239_v37 = vld [vmem:[#allocation5 + $0xde0] sm:$0xff]  }
 0x1c3   :  { %6651 = vmatpush3.bf16.msra.mxu1 %v7201_v38  ;;  %6630 = vmatprep.subr.bf16.mxu0 %v7202_v39 }
 0x1c4   :  { %6652 = vmatprep.subr.bf16.mxu1 %v7203_v40  ;;  %v7240_v40 = vld [vmem:[#allocation5 + $0xd20] sm:$0xff]  }
 0x1c6   :  { %6631 = vmatpush3.bf16.msra.mxu0 %v7204_v42 }
 0x1c7   :  { %6653 = vmatpush3.bf16.msra.mxu1 %v7205_v44  ;;  %6632 = vmatprep.subr.bf16.mxu0 %v7206_v46  ;;  %v7242_v46 = vld [vmem:[#allocation5 + $0xd68] sm:$0xff]  }
 0x1c8   :  { %6654 = vmatprep.subr.bf16.mxu1 %v7207_v49  ;;  %v7244_v49 = vld [vmem:[#allocation5 + $0xd28] sm:$0xff]  }
 0x1ca   :  { %6633 = vmatpush3.bf16.msra.mxu0 %v7208_v52  ;;  %v7247_v52 = vld [vmem:[#allocation5 + $0xdf0] sm:$0xff]  }
 0x1cb   :  { %6655 = vmatpush3.bf16.msra.mxu1 %v7209_v55  ;;  %6634 = vmatprep.subr.bf16.mxu0 %v7210_v58  ;;  %v7250_v55 = vld [vmem:[#allocation5 + $0xd78] sm:$0xff]  }
 0x1cc   :  { %v6332_v41 = vpop.f32.mrb[20].mxu0  ;;  %6656 = vmatprep.subr.bf16.mxu1 %v7211_v60  ;;  %v7253_v58 = vld [vmem:[#allocation5 + $0xdb8] sm:$0xff]  }
 0x1cd   :  { %v6354_v43 = vpop.f32.mrb[20].mxu1  ;;  %v6333_v45 = vpop.f32.mrb[21].mxu0  ;;  %v108_v60 = vld [vmem:[#allocation2 + $0x1b8] sm:$0xff] }
 0x1ce   :  { %v6334_v47 = vadd.f32 %v6333_v45, %v6332_v41  ;;  %v6355_v48 = vpop.f32.mrb[21].mxu1  ;;  %v6335_v51 = vpop.f32.mrb[22].mxu0  ;;  %6635 = vmatpush3.bf16.msra.mxu0 %v7212_v61 }
 0x1cf   :  { %v6356_v50 = vadd.f32 %v6355_v48, %v6354_v43  ;;  %v6357_v54 = vpop.f32.mrb[22].mxu1  ;;  %v6336_v56 = vpop.f32.mrb[23].mxu0  ;;  %6657 = vmatpush3.bf16.msra.mxu1 %v7213_v62  ;;  %6636 = vmatprep.subr.bf16.mxu0 %v7214_v63  ;;  %v7241_v43 = vld [vmem:[#allocation5 + $0xda0] sm:$0xff]   ;;  %v7243_v48 = vld [vmem:[#allocation5 + $0xde8] sm:$0xff]   ;;  %v7246_v51 = vld [vmem:[#allocation5 + $0xd70] sm:$0xff]   ;;  %v172_v62 = vpack.c.bf16 %v108_v60, %v108_v60 }
 0x1d0   :  { %v4712_v53 = vadd.f32 %v6334_v47, %v7486_v5  ;;  %v6358_v59 = vpop.f32.mrb[23].mxu1  ;;  %6658 = vmatprep.subr.bf16.mxu1 %v7215_v0  ;;  %v7220_v5 = vld [vmem:[#allocation5 + $0xc38] sm:$0xff]   ;;  %v7249_v54 = vld [vmem:[#allocation5 + $0xdb0] sm:$0xff]   ;;  %v105_v63 = vld [vmem:[#allocation2 + $0x1a0] sm:$0xff] }
 0x1d1   :  { %v7251_v56 = vld [vmem:[#allocation5 + $0xdf8] sm:$0xff]   ;;  %v106_v59 = vld [vmem:[#allocation2 + $0x1a8] sm:$0xff]  ;;  %v107_v0 = vld [vmem:[#allocation2 + $0x1b0] sm:$0xff] }
 0x1d2   :  { %v7489_v57 = vadd.f32 %v6356_v50, %v4712_v53  ;;  %6637 = vmatpush3.bf16.msra.mxu0 %v7216_v1  ;;  %v7245_v50 = vld [vmem:[#allocation5 + $0xda8] sm:$0xff]   ;;  %v7248_v53 = vld [vmem:[#allocation5 + $0xd30] sm:$0xff]   ;;  %v170_v61 = vpack.c.bf16 %v106_v59, %v106_v59  ;;  %v169_v1 = vpack.c.bf16 %v105_v63, %v105_v63 }
 0x1d3   :  { %6659 = vmatpush3.bf16.msra.mxu1 %v7217_v2  ;;  %6638 = vmatprep.subr.bf16.mxu0 %v7218_v3  ;;  %v171_v2 = vpack.c.bf16 %v107_v0, %v107_v0  ;;  %v7254_v3 = vld [vmem:[#allocation5 + $0xe40] sm:$0xff]   ;;  %v7290_v59 = vld [vmem:[#allocation5 + $0xf48] sm:$0xff]   ;;  %v7294_v63 = vld [vmem:[#allocation5 + $0xf50] sm:$0xff]  }
 0x1d4   :  { %6660 = vmatprep.subr.bf16.mxu1 %v7219_v4  ;;  %v7255_v4 = vld [vmem:[#allocation5 + $0xec0] sm:$0xff]   ;;  %v7291_v60 = vld [vmem:[#allocation5 + $0xfc8] sm:$0xff]   ;;  %v7295_v0 = vld [vmem:[#allocation5 + $0xfd0] sm:$0xff]  }
 0x1d6   :  { %6639 = vmatpush3.bf16.msra.mxu0 %v7220_v5  ;;  %v7256_v5 = vld [vmem:[#allocation5 + $0xe00] sm:$0xff]  }
 0x1d7   :  { %6661 = vmatpush3.bf16.msra.mxu1 %v7221_v6  ;;  %6668 = vmatprep.subr.bf16.mxu0 %v7222_v15  ;;  %v7257_v6 = vld [vmem:[#allocation5 + $0xe80] sm:$0xff]   ;;  %v7266_v15 = vld [vmem:[#allocation5 + $0xe58] sm:$0xff]  }
 0x1d8   :  { %6690 = vmatprep.subr.bf16.mxu1 %v7223_v16  ;;  %v7267_v16 = vld [vmem:[#allocation5 + $0xed8] sm:$0xff]  }
 0x1d9   :  { %5270 = vmatmul.mubr.bf16.vlgmr.msra.gmra.mrb[48].mxu0 %v165_v12  ;;  %v7263_v12 = vld [vmem:[#allocation5 + $0xed0] sm:$0xff]  }
 0x1da   :  { %5310 = vmatmul.mubr.bf16.vlgmr.msra.gmra.mrb[48].mxu1 %v167_v14  ;;  %6669 = vmatpush3.bf16.msra.mxu0 %v7224_v17  ;;  %v7265_v14 = vld [vmem:[#allocation5 + $0xe90] sm:$0xff]  }
 0x1db   :  { %6691 = vmatpush3.bf16.msra.mxu1 %v7225_v18  ;;  %6670 = vmatprep.subr.bf16.mxu0 %v7226_v19  ;;  %v7268_v18 = vld [vmem:[#allocation5 + $0xe18] sm:$0xff]  }
 0x1dc   :  { %6692 = vmatprep.subr.bf16.mxu1 %v7227_v20  ;;  %5349 = vmatprep.mubr.bf16.mxu0 %v170_v61  ;;  %v7269_v20 = vld [vmem:[#allocation5 + $0xe98] sm:$0xff]   ;;  %v7292_v61 = vld [vmem:[#allocation5 + $0xf08] sm:$0xff]  }
 0x1dd   :  { %5389 = vmatprep.mubr.bf16.mxu1 %v172_v62  ;;  %v7293_v62 = vld [vmem:[#allocation5 + $0xf88] sm:$0xff]  }
 0x1de   :  { %6671 = vmatpush3.bf16.msra.mxu0 %v7228_v21 }
 0x1df   :  { %6693 = vmatpush3.bf16.msra.mxu1 %v7229_v22  ;;  %6672 = vmatprep.subr.bf16.mxu0 %v7230_v23  ;;  %v7270_v22 = vld [vmem:[#allocation5 + $0xe60] sm:$0xff]  }
 0x1e0   :  { %6694 = vmatprep.subr.bf16.mxu1 %v7231_v24 }
 0x1e2   :  { %6673 = vmatpush3.bf16.msra.mxu0 %v7232_v25  ;;  %v7271_v25 = vld [vmem:[#allocation5 + $0xee0] sm:$0xff]  }
 0x1e3   :  { %6695 = vmatpush3.bf16.msra.mxu1 %v7233_v26  ;;  %6674 = vmatprep.subr.bf16.mxu0 %v7234_v27 }
 0x1e4   :  { %6696 = vmatprep.subr.bf16.mxu1 %v7235_v28  ;;  %v7272_v28 = vld [vmem:[#allocation5 + $0xe20] sm:$0xff]  }
 0x1e6   :  { %6675 = vmatpush3.bf16.msra.mxu0 %v7236_v30 }
 0x1e7   :  { %6697 = vmatpush3.bf16.msra.mxu1 %v7237_v32  ;;  %6676 = vmatprep.subr.bf16.mxu0 %v7238_v34  ;;  %v7274_v34 = vld [vmem:[#allocation5 + $0xe68] sm:$0xff]  }
 0x1e8   :  { %6698 = vmatprep.subr.bf16.mxu1 %v7239_v37  ;;  %v7276_v37 = vld [vmem:[#allocation5 + $0xe28] sm:$0xff]  }
 0x1ea   :  { %6677 = vmatpush3.bf16.msra.mxu0 %v7240_v40  ;;  %v7279_v40 = vld [vmem:[#allocation5 + $0xef0] sm:$0xff]  }
 0x1eb   :  { %6699 = vmatpush3.bf16.msra.mxu1 %v7241_v43  ;;  %6678 = vmatprep.subr.bf16.mxu0 %v7242_v46  ;;  %v7282_v43 = vld [vmem:[#allocation5 + $0xe78] sm:$0xff]  }
 0x1ec   :  { %v6376_v29 = vpop.f32.mrb[24].mxu0  ;;  %6700 = vmatprep.subr.bf16.mxu1 %v7243_v48  ;;  %v7285_v46 = vld [vmem:[#allocation5 + $0xeb8] sm:$0xff]  }
 0x1ed   :  { %v6398_v31 = vpop.f32.mrb[24].mxu1  ;;  %v6377_v33 = vpop.f32.mrb[25].mxu0 }
 0x1ee   :  { %v6378_v35 = vadd.f32 %v6377_v33, %v6376_v29  ;;  %v6399_v36 = vpop.f32.mrb[25].mxu1  ;;  %v6379_v39 = vpop.f32.mrb[26].mxu0  ;;  %6679 = vmatpush3.bf16.msra.mxu0 %v7244_v49  ;;  %v112_v49 = vld [vmem:[#allocation2 + $0x1d8] sm:$0xff] }
 0x1ef   :  { %v6400_v38 = vadd.f32 %v6399_v36, %v6398_v31  ;;  %v6401_v42 = vpop.f32.mrb[26].mxu1  ;;  %v6380_v44 = vpop.f32.mrb[27].mxu0  ;;  %6701 = vmatpush3.bf16.msra.mxu1 %v7245_v50  ;;  %6680 = vmatprep.subr.bf16.mxu0 %v7246_v51  ;;  %v7273_v31 = vld [vmem:[#allocation5 + $0xea0] sm:$0xff]   ;;  %v7275_v36 = vld [vmem:[#allocation5 + $0xee8] sm:$0xff]   ;;  %v7278_v39 = vld [vmem:[#allocation5 + $0xe70] sm:$0xff]  }
 0x1f0   :  { %v4792_v41 = vadd.f32 %v6378_v35, %v7489_v57  ;;  %v6402_v47 = vpop.f32.mrb[27].mxu1  ;;  %6702 = vmatprep.subr.bf16.mxu1 %v7247_v52  ;;  %v7252_v57 = vld [vmem:[#allocation5 + $0xd38] sm:$0xff]   ;;  %v7281_v42 = vld [vmem:[#allocation5 + $0xeb0] sm:$0xff]   ;;  %v109_v50 = vld [vmem:[#allocation2 + $0x1c0] sm:$0xff]  ;;  %v176_v52 = vpack.c.bf16 %v112_v49, %v112_v49 }
 0x1f1   :  { %v7283_v44 = vld [vmem:[#allocation5 + $0xef8] sm:$0xff]   ;;  %v110_v47 = vld [vmem:[#allocation2 + $0x1c8] sm:$0xff]  ;;  %v111_v51 = vld [vmem:[#allocation2 + $0x1d0] sm:$0xff] }
 0x1f2   :  { %v7492_v45 = vadd.f32 %v6400_v38, %v4792_v41  ;;  %6681 = vmatpush3.bf16.msra.mxu0 %v7248_v53  ;;  %v7277_v38 = vld [vmem:[#allocation5 + $0xea8] sm:$0xff]   ;;  %v7280_v41 = vld [vmem:[#allocation5 + $0xe30] sm:$0xff]   ;;  %v174_v48 = vpack.c.bf16 %v110_v47, %v110_v47  ;;  %v173_v53 = vpack.c.bf16 %v109_v50, %v109_v50 }
 0x1f3   :  { %6703 = vmatpush3.bf16.msra.mxu1 %v7249_v54  ;;  %6682 = vmatprep.subr.bf16.mxu0 %v7250_v55  ;;  %v175_v54 = vpack.c.bf16 %v111_v51, %v111_v51  ;;  %v7286_v55 = vld [vmem:[#allocation5 + $0xf40] sm:$0xff]  }
 0x1f4   :  { %6704 = vmatprep.subr.bf16.mxu1 %v7251_v56  ;;  %v7287_v56 = vld [vmem:[#allocation5 + $0xfc0] sm:$0xff]  }
 0x1f6   :  { %6683 = vmatpush3.bf16.msra.mxu0 %v7252_v57  ;;  %v7288_v57 = vld [vmem:[#allocation5 + $0xf00] sm:$0xff]  }
 0x1f7   :  { %6705 = vmatpush3.bf16.msra.mxu1 %v7253_v58  ;;  %6712 = vmatprep.subr.bf16.mxu0 %v7254_v3  ;;  %v7289_v58 = vld [vmem:[#allocation5 + $0xf80] sm:$0xff]   ;;  %v7298_v3 = vld [vmem:[#allocation5 + $0xf58] sm:$0xff]  }
 0x1f8   :  { %6734 = vmatprep.subr.bf16.mxu1 %v7255_v4  ;;  %v7299_v4 = vld [vmem:[#allocation5 + $0xfd8] sm:$0xff]  }
 0x1f9   :  { %5350 = vmatmul.mubr.bf16.vlgmr.msra.gmra.mrb[52].mxu0 %v169_v1  ;;  %v7296_v1 = vld [vmem:[#allocation5 + $0xf10] sm:$0xff]  }
 0x1fa   :  { %5390 = vmatmul.mubr.bf16.vlgmr.msra.gmra.mrb[52].mxu1 %v171_v2  ;;  %6713 = vmatpush3.bf16.msra.mxu0 %v7256_v5  ;;  %v7297_v2 = vld [vmem:[#allocation5 + $0xf90] sm:$0xff]  }
 0x1fb   :  { %6735 = vmatpush3.bf16.msra.mxu1 %v7257_v6  ;;  %6714 = vmatprep.subr.bf16.mxu0 %v7258_v7  ;;  %v7300_v6 = vld [vmem:[#allocation5 + $0xf18] sm:$0xff]  }
 0x1fc   :  { %6736 = vmatprep.subr.bf16.mxu1 %v7259_v8  ;;  %5429 = vmatprep.mubr.bf16.mxu0 %v174_v48  ;;  %v7301_v8 = vld [vmem:[#allocation5 + $0xf98] sm:$0xff]  }
 0x1fd   :  { %5469 = vmatprep.mubr.bf16.mxu1 %v176_v52 }
 0x1fe   :  { %6715 = vmatpush3.bf16.msra.mxu0 %v7260_v9 }
 0x1ff   :  { %6737 = vmatpush3.bf16.msra.mxu1 %v7261_v10  ;;  %6716 = vmatprep.subr.bf16.mxu0 %v7262_v11  ;;  %v7302_v10 = vld [vmem:[#allocation5 + $0xf60] sm:$0xff]  }
 0x200   :  { %6738 = vmatprep.subr.bf16.mxu1 %v7263_v12 }
 0x202   :  { %6717 = vmatpush3.bf16.msra.mxu0 %v7264_v13  ;;  %v7303_v13 = vld [vmem:[#allocation5 + $0xfe0] sm:$0xff]  }
 0x203   :  { %6739 = vmatpush3.bf16.msra.mxu1 %v7265_v14  ;;  %6718 = vmatprep.subr.bf16.mxu0 %v7266_v15 }
 0x204   :  { %6740 = vmatprep.subr.bf16.mxu1 %v7267_v16  ;;  %v7304_v16 = vld [vmem:[#allocation5 + $0xf20] sm:$0xff]  }
 0x206   :  { %6719 = vmatpush3.bf16.msra.mxu0 %v7268_v18 }
 0x207   :  { %6741 = vmatpush3.bf16.msra.mxu1 %v7269_v20  ;;  %6720 = vmatprep.subr.bf16.mxu0 %v7270_v22  ;;  %v7306_v22 = vld [vmem:[#allocation5 + $0xf68] sm:$0xff]  }
 0x208   :  { %6742 = vmatprep.subr.bf16.mxu1 %v7271_v25  ;;  %v7308_v25 = vld [vmem:[#allocation5 + $0xf28] sm:$0xff]  }
 0x20a   :  { %6721 = vmatpush3.bf16.msra.mxu0 %v7272_v28  ;;  %v7311_v28 = vld [vmem:[#allocation5 + $0xff0] sm:$0xff]  }
 0x20b   :  { %6743 = vmatpush3.bf16.msra.mxu1 %v7273_v31  ;;  %6722 = vmatprep.subr.bf16.mxu0 %v7274_v34  ;;  %v7314_v31 = vld [vmem:[#allocation5 + $0xf78] sm:$0xff]  }
 0x20c   :  { %v6420_v17 = vpop.f32.mrb[28].mxu0  ;;  %6744 = vmatprep.subr.bf16.mxu1 %v7275_v36  ;;  %v7317_v34 = vld [vmem:[#allocation5 + $0xfb8] sm:$0xff]  }
 0x20d   :  { %v6442_v19 = vpop.f32.mrb[28].mxu1  ;;  %v6421_v21 = vpop.f32.mrb[29].mxu0  ;;  %v116_v36 = vld [vmem:[#allocation2 + $0x1f8] sm:$0xff] }
 0x20e   :  { %v6422_v23 = vadd.f32 %v6421_v21, %v6420_v17  ;;  %v6443_v24 = vpop.f32.mrb[29].mxu1  ;;  %v6423_v27 = vpop.f32.mrb[30].mxu0  ;;  %6723 = vmatpush3.bf16.msra.mxu0 %v7276_v37  ;;  %v113_v37 = vld [vmem:[#allocation2 + $0x1e0] sm:$0xff] }
 0x20f   :  { %v6444_v26 = vadd.f32 %v6443_v24, %v6442_v19  ;;  %v6445_v30 = vpop.f32.mrb[30].mxu1  ;;  %v6424_v32 = vpop.f32.mrb[31].mxu0  ;;  %6745 = vmatpush3.bf16.msra.mxu1 %v7277_v38  ;;  %6724 = vmatprep.subr.bf16.mxu0 %v7278_v39  ;;  %v7305_v19 = vld [vmem:[#allocation5 + $0xfa0] sm:$0xff]   ;;  %v7307_v24 = vld [vmem:[#allocation5 + $0xfe8] sm:$0xff]   ;;  %v7310_v27 = vld [vmem:[#allocation5 + $0xf70] sm:$0xff]   ;;  %v180_v39 = vpack.c.bf16 %v116_v36, %v116_v36 }
 0x210   :  { %v4872_v29 = vadd.f32 %v6422_v23, %v7492_v45  ;;  %v6446_v35 = vpop.f32.mrb[31].mxu1  ;;  %6746 = vmatprep.subr.bf16.mxu1 %v7279_v40  ;;  %v7284_v45 = vld [vmem:[#allocation5 + $0xe38] sm:$0xff]   ;;  %v7313_v30 = vld [vmem:[#allocation5 + $0xfb0] sm:$0xff]   ;;  %v177_v40 = vpack.c.bf16 %v113_v37, %v113_v37 }
 0x211   :  { %v7315_v32 = vld [vmem:[#allocation5 + $0xff8] sm:$0xff]   ;;  %v114_v35 = vld [vmem:[#allocation2 + $0x1e8] sm:$0xff] }
 0x212   :  { %v7495_v33 = vadd.f32 %v6444_v26, %v4872_v29  ;;  %6725 = vmatpush3.bf16.msra.mxu0 %v7280_v41  ;;  %v7309_v26 = vld [vmem:[#allocation5 + $0xfa8] sm:$0xff]   ;;  %v7312_v29 = vld [vmem:[#allocation5 + $0xf30] sm:$0xff]   ;;  %v178_v38 = vpack.c.bf16 %v114_v35, %v114_v35 }
 0x213   :  { %6747 = vmatpush3.bf16.msra.mxu1 %v7281_v42  ;;  %6726 = vmatprep.subr.bf16.mxu0 %v7282_v43  ;;  %v115_v41 = vld [vmem:[#allocation2 + $0x1f0] sm:$0xff] }
 0x214   :  { %6748 = vmatprep.subr.bf16.mxu1 %v7283_v44  ;;  %v179_v42 = vpack.c.bf16 %v115_v41, %v115_v41 }
 0x216   :  { %6727 = vmatpush3.bf16.msra.mxu0 %v7284_v45 }
 0x217   :  { %6749 = vmatpush3.bf16.msra.mxu1 %v7285_v46  ;;  %6756 = vmatprep.subr.bf16.mxu0 %v7286_v55 }
 0x218   :  { %6778 = vmatprep.subr.bf16.mxu1 %v7287_v56 }
 0x219   :  { %5430 = vmatmul.mubr.bf16.vlgmr.msra.gmra.mrb[56].mxu0 %v173_v53 }
 0x21a   :  { %5470 = vmatmul.mubr.bf16.vlgmr.msra.gmra.mrb[56].mxu1 %v175_v54  ;;  %6757 = vmatpush3.bf16.msra.mxu0 %v7288_v57 }
 0x21b   :  { %6779 = vmatpush3.bf16.msra.mxu1 %v7289_v58  ;;  %6758 = vmatprep.subr.bf16.mxu0 %v7290_v59 }
 0x21c   :  { %6780 = vmatprep.subr.bf16.mxu1 %v7291_v60  ;;  %5509 = vmatprep.mubr.bf16.mxu0 %v178_v38 }
 0x21d   :  { %5549 = vmatprep.mubr.bf16.mxu1 %v180_v39 }
 0x21e   :  { %6759 = vmatpush3.bf16.msra.mxu0 %v7292_v61 }
 0x21f   :  { %6781 = vmatpush3.bf16.msra.mxu1 %v7293_v62  ;;  %6760 = vmatprep.subr.bf16.mxu0 %v7294_v63 }
 0x220   :  { %6782 = vmatprep.subr.bf16.mxu1 %v7295_v0 }
 0x222   :  { %6761 = vmatpush3.bf16.msra.mxu0 %v7296_v1 }
 0x223   :  { %6783 = vmatpush3.bf16.msra.mxu1 %v7297_v2  ;;  %6762 = vmatprep.subr.bf16.mxu0 %v7298_v3 }
 0x224   :  { %6784 = vmatprep.subr.bf16.mxu1 %v7299_v4 }
 0x226   :  { %6763 = vmatpush3.bf16.msra.mxu0 %v7300_v6 }
 0x227   :  { %6785 = vmatpush3.bf16.msra.mxu1 %v7301_v8  ;;  %6764 = vmatprep.subr.bf16.mxu0 %v7302_v10 }
 0x228   :  { %6786 = vmatprep.subr.bf16.mxu1 %v7303_v13 }
 0x22a   :  { %6765 = vmatpush3.bf16.msra.mxu0 %v7304_v16 }
 0x22b   :  { %6787 = vmatpush3.bf16.msra.mxu1 %v7305_v19  ;;  %6766 = vmatprep.subr.bf16.mxu0 %v7306_v22 }
 0x22c   :  { %v6464_v5 = vpop.f32.mrb[32].mxu0  ;;  %6788 = vmatprep.subr.bf16.mxu1 %v7307_v24 }
 0x22d   :  { %v6486_v7 = vpop.f32.mrb[32].mxu1  ;;  %v6465_v9 = vpop.f32.mrb[33].mxu0 }
 0x22e   :  { %v6466_v11 = vadd.f32 %v6465_v9, %v6464_v5  ;;  %v6487_v12 = vpop.f32.mrb[33].mxu1  ;;  %v6467_v15 = vpop.f32.mrb[34].mxu0  ;;  %6767 = vmatpush3.bf16.msra.mxu0 %v7308_v25 }
 0x22f   :  { %v6488_v14 = vadd.f32 %v6487_v12, %v6486_v7  ;;  %v6489_v18 = vpop.f32.mrb[34].mxu1  ;;  %v6468_v20 = vpop.f32.mrb[35].mxu0  ;;  %6789 = vmatpush3.bf16.msra.mxu1 %v7309_v26  ;;  %6768 = vmatprep.subr.bf16.mxu0 %v7310_v27 }
 0x230   :  { %v4952_v17 = vadd.f32 %v6466_v11, %v7495_v33  ;;  %v6490_v23 = vpop.f32.mrb[35].mxu1  ;;  %6790 = vmatprep.subr.bf16.mxu1 %v7311_v28  ;;  %v7316_v33 = vld [vmem:[#allocation5 + $0xf38] sm:$0xff]  }
 0x232   :  { %v4992_v21 = vadd.f32 %v6488_v14, %v4952_v17  ;;  %6769 = vmatpush3.bf16.msra.mxu0 %v7312_v29 }
 0x233   :  { %6791 = vmatpush3.bf16.msra.mxu1 %v7313_v30  ;;  %6770 = vmatprep.subr.bf16.mxu0 %v7314_v31 }
 0x234   :  { %6792 = vmatprep.subr.bf16.mxu1 %v7315_v32 }
 0x236   :  { %6771 = vmatpush3.bf16.msra.mxu0 %v7316_v33 }
 0x237   :  { %6793 = vmatpush3.bf16.msra.mxu1 %v7317_v34 }
 0x239   :  { %5510 = vmatmul.mubr.bf16.vlgmr.msra.gmra.mrb[60].mxu0 %v177_v40 }
 0x23a   :  { %5550 = vmatmul.mubr.bf16.vlgmr.msra.gmra.mrb[60].mxu1 %v179_v42 }
 0x24c   :  { %v6508_v43 = vpop.f32.mrb[36].mxu0 }
 0x24d   :  { %v6530_v44 = vpop.f32.mrb[36].mxu1  ;;  %v6509_v45 = vpop.f32.mrb[37].mxu0 }
 0x24e   :  { %v6531_v46 = vpop.f32.mrb[37].mxu1  ;;  %v6510_v47 = vadd.f32 %v6509_v45, %v6508_v43  ;;  %v6511_v49 = vpop.f32.mrb[38].mxu0 }
 0x24f   :  { %v6532_v48 = vadd.f32 %v6531_v46, %v6530_v44  ;;  %v6533_v50 = vpop.f32.mrb[38].mxu1  ;;  %v6512_v51 = vpop.f32.mrb[39].mxu0 }
 0x250   :  { %v6534_v52 = vpop.f32.mrb[39].mxu1  ;;  %v5032_v53 = vadd.f32 %v6510_v47, %v4992_v21 }
 0x252   :  { %v5072_v54 = vadd.f32 %v6532_v48, %v5032_v53 }
 0x26c   :  { %v6552_v55 = vpop.f32.mrb[40].mxu0 }
 0x26d   :  { %v6574_v56 = vpop.f32.mrb[40].mxu1  ;;  %v6553_v57 = vpop.f32.mrb[41].mxu0 }
 0x26e   :  { %v6554_v58 = vadd.f32 %v6553_v57, %v6552_v55  ;;  %v6575_v59 = vpop.f32.mrb[41].mxu1  ;;  %v6555_v60 = vpop.f32.mrb[42].mxu0 }
 0x26f   :  { %v6576_v61 = vadd.f32 %v6575_v59, %v6574_v56  ;;  %v6577_v62 = vpop.f32.mrb[42].mxu1  ;;  %v6556_v63 = vpop.f32.mrb[43].mxu0 }
 0x270   :  { %v5112_v0 = vadd.f32 %v6554_v58, %v5072_v54  ;;  %v6578_v1 = vpop.f32.mrb[43].mxu1  ;;  %v6095_v63 = vld [vmem:[#allocation7] ss:$0 sm:$0xff] }
 0x272   :  { %v5152_v2 = vadd.f32 %v6576_v61, %v5112_v0 }
 0x28c   :  { %v6596_v3 = vpop.f32.mrb[44].mxu0 }
 0x28d   :  { %v6618_v4 = vpop.f32.mrb[44].mxu1  ;;  %v6597_v5 = vpop.f32.mrb[45].mxu0 }
 0x28e   :  { %v6598_v6 = vadd.f32 %v6597_v5, %v6596_v3  ;;  %v6619_v7 = vpop.f32.mrb[45].mxu1  ;;  %v6599_v8 = vpop.f32.mrb[46].mxu0 }
 0x28f   :  { %v6620_v9 = vadd.f32 %v6619_v7, %v6618_v4  ;;  %v6621_v10 = vpop.f32.mrb[46].mxu1  ;;  %v6600_v11 = vpop.f32.mrb[47].mxu0 }
 0x290   :  { %v5192_v12 = vadd.f32 %v6598_v6, %v5152_v2  ;;  %v6622_v13 = vpop.f32.mrb[47].mxu1 }
 0x292   :  { %v5232_v14 = vadd.f32 %v6620_v9, %v5192_v12 }
 0x2ac   :  { %v6640_v15 = vpop.f32.mrb[48].mxu0 }
 0x2ad   :  { %v6662_v16 = vpop.f32.mrb[48].mxu1  ;;  %v6641_v17 = vpop.f32.mrb[49].mxu0 }
 0x2ae   :  { %v6663_v18 = vpop.f32.mrb[49].mxu1  ;;  %v6642_v19 = vadd.f32 %v6641_v17, %v6640_v15  ;;  %v6643_v21 = vpop.f32.mrb[50].mxu0 }
 0x2af   :  { %v6664_v20 = vadd.f32 %v6663_v18, %v6662_v16  ;;  %v6665_v22 = vpop.f32.mrb[50].mxu1  ;;  %v6644_v23 = vpop.f32.mrb[51].mxu0 }
 0x2b0   :  { %v6666_v24 = vpop.f32.mrb[51].mxu1  ;;  %v5272_v25 = vadd.f32 %v6642_v19, %v5232_v14 }
 0x2b2   :  { %v5312_v26 = vadd.f32 %v6664_v20, %v5272_v25 }
 0x2cc   :  { %v6684_v27 = vpop.f32.mrb[52].mxu0 }
 0x2cd   :  { %v6706_v28 = vpop.f32.mrb[52].mxu1  ;;  %v6685_v29 = vpop.f32.mrb[53].mxu0 }
 0x2ce   :  { %v6686_v30 = vadd.f32 %v6685_v29, %v6684_v27  ;;  %v6707_v31 = vpop.f32.mrb[53].mxu1  ;;  %v6687_v32 = vpop.f32.mrb[54].mxu0 }
 0x2cf   :  { %v6708_v33 = vadd.f32 %v6707_v31, %v6706_v28  ;;  %v6709_v34 = vpop.f32.mrb[54].mxu1  ;;  %v6688_v35 = vpop.f32.mrb[55].mxu0 }
 0x2d0   :  { %v5352_v36 = vadd.f32 %v6686_v30, %v5312_v26  ;;  %v6710_v37 = vpop.f32.mrb[55].mxu1 }
 0x2d2   :  { %v5392_v38 = vadd.f32 %v6708_v33, %v5352_v36 }
 0x2ec   :  { %v6728_v39 = vpop.f32.mrb[56].mxu0 }
 0x2ed   :  { %v6750_v40 = vpop.f32.mrb[56].mxu1  ;;  %v6729_v41 = vpop.f32.mrb[57].mxu0 }
 0x2ee   :  { %v6730_v42 = vadd.f32 %v6729_v41, %v6728_v39  ;;  %v6751_v43 = vpop.f32.mrb[57].mxu1  ;;  %v6731_v44 = vpop.f32.mrb[58].mxu0 }
 0x2ef   :  { %v6752_v45 = vadd.f32 %v6751_v43, %v6750_v40  ;;  %v6753_v46 = vpop.f32.mrb[58].mxu1  ;;  %v6732_v47 = vpop.f32.mrb[59].mxu0 }
 0x2f0   :  { %v5432_v48 = vadd.f32 %v6730_v42, %v5392_v38  ;;  %v6754_v49 = vpop.f32.mrb[59].mxu1 }
 0x2f2   :  { %v5472_v50 = vadd.f32 %v6752_v45, %v5432_v48 }
 0x30c   :  { %v6772_v51 = vpop.f32.mrb[60].mxu0 }
 0x30d   :  { %v6794_v52 = vpop.f32.mrb[60].mxu1  ;;  %v6773_v53 = vpop.f32.mrb[61].mxu0 }
 0x30e   :  { %v6795_v54 = vpop.f32.mrb[61].mxu1  ;;  %v6774_v55 = vadd.f32 %v6773_v53, %v6772_v51  ;;  %v6775_v57 = vpop.f32.mrb[62].mxu0 }
 0x30f   :  { %v6796_v56 = vadd.f32 %v6795_v54, %v6794_v52  ;;  %v6797_v58 = vpop.f32.mrb[62].mxu1  ;;  %v6776_v59 = vpop.f32.mrb[63].mxu0 }
 0x310   :  { %v6798_v60 = vpop.f32.mrb[63].mxu1  ;;  %v5512_v61 = vadd.f32 %v6774_v55, %v5472_v50 }
 0x312   :  { %v5552_v62 = vadd.f32 %v6796_v56, %v5512_v61 }
 0x314   :  { %v5557_v0 = vmul.f32 0.0625, %v5552_v62 }
 0x316   :  { %v5565_v1 = vadd.f32 %v6095_v63, %v5557_v0 }
 0x318   :  { %5566 = vst [vmem:[#allocation8] sm:$0xff] %v5565_v1 }
 0x319   :  { %7395 = shalt.err (!%p7392_p0)
}
 0x31a   :  { %s7396_s26 = scalar_lea.hbm %s7513_s3, 128 }
 0x31b   :  { %p7397_p1 = scmp.ne.s32.totalorder %s7513_s3, %s7396_s26  ;;  %p7400_p2 = scmp.lt.u32.totalorder %s7396_s26, %s7513_s3 }
 0x31d   :  { %p7402_p3 = pnand %p7400_p2, %p7397_p1 }
 0x31f   :  { %7405 = shalt.err (!%p7402_p3)
}
 0x320   :  { %5576 = dma.vmem_to_hbm [thread:$0]  %s5574_s22, 128, %s7513_s3, [#allocation4]  }
 0x321   :  { %7410 = dma.done.wait [#allocation4], 128  }
 0x322   :  { %7411 = vsyncadd [#allocation4], 4294967168 }
 0x323   :  { %5580 = vsyncpa [#allocation3], 1 }
 0x324   :  { %5581 = vsyncpa [#allocation6], 1 }
 0x325   :  { %5582 = vsyncpa [#allocation4], 1 }

</bundles_post_ra>
